<compile_context>
chip_gen: v6e
topology: v6e:2x2x1
jax: 0.10.0
libtpu: 0.0.40
codegen_flags: <defaults>
</compile_context>

<pallas_src>
import functools

import jax
import jax.numpy as jnp
from jax import lax
from jax.experimental import pallas as pl
from jax.experimental.pallas import tpu as pltpu

LANE = 128       # TPU lane width; fc2 is padded to this many output lanes for the MXU.
NEG_BIG = -1e30  # baked into padded b2 lanes -> padded logits can never win the softmax.


def _round_up(n, m):
    return ((n + m - 1) // m) * m


def _default_num_tiles():
    """1 grid step on single-TC chips (v5e/v6e), 2 on v7x (2 TensorCores per chip)."""
    try:
        kind = jax.devices()[0].device_kind.lower()
    except Exception:
        return 1
    return 2 if "v7" in kind else 1


def prepare_params(w1, b1, w2, b2):
    """One-time param prep, hoisted out of the per-step forward call.

    Pads fc2 to LANE output lanes: zero weight columns and NEG_BIG bias on the padded
    lanes (kept in f32 so the value survives the fc2 add unchanged). With zero weight
    columns, padded logits are exactly NEG_BIG -> no in-kernel iota/where mask needed.
    """
    H, A = w2.shape
    assert A <= LANE
    w2p = jnp.pad(w2.astype(jnp.float32), ((0, 0), (0, LANE - A)))
    b2p = jnp.pad(b2.astype(jnp.float32), ((0, 0), (0, LANE - A)),
                  constant_values=NEG_BIG)
    return w1.astype(jnp.float32), b1.astype(jnp.float32), w2p, b2p, A


def _policy_kernel(x_ref, w1_ref, b1_ref, w2_ref, b2_ref, o_ref, *,
                   state_dim, action_dim, chunk):
    """One batch tile: Linear(S->H) + ReLU + Linear(H->LANE, padded) + softmax.

    The tile is processed in `chunk`-row sub-chunks inside a fori_loop so the f32
    [chunk, LANE] intermediates stay within the 64-vreg file (no spills at big tiles).
    """
    w1 = w1_ref[...]                                    # [S, H]
    hid = w1.shape[1]
    b1 = jnp.broadcast_to(b1_ref[...], (chunk, hid))    # hoisted out of the loop (no re-broadcast)
    w2 = w2_ref[...]                                    # [H, LANE] (zero-padded cols)
    b2 = b2_ref[...]                                    # [1, LANE] (NEG_BIG on padded lanes)
    n_chunks = x_ref.shape[0] // chunk

    def body(c, carry):
        row0 = pl.multiple_of(c * chunk, chunk)

        # fc1 as `state_dim` broadcast-FMAs on the VPU: K=4 is far too small for the MXU.
        # Column-indexed loads from the ref keep the live x footprint to one column.
        h = b1
        for k in range(state_dim):                      # static unroll, state_dim is tiny
            xk = x_ref[pl.ds(row0, chunk), pl.ds(k, 1)]  # [chunk, 1]
            h = h + xk * w1[k:k + 1, :]
        h = jnp.maximum(h, 0.0)

        # fc2 on the MXU: [chunk, H] x [H, LANE]; padded lanes are exactly NEG_BIG via b2.
        logits = jnp.dot(h, w2, preferred_element_type=jnp.float32) + b2

        # Numerically-stable softmax; padded lanes underflow to exactly 0 in exp().
        m = jnp.max(logits, axis=-1, keepdims=True)
        e = jnp.exp(logits - m)
        denom = jnp.sum(e, axis=-1, keepdims=True)
        inv = pl.reciprocal(denom, approx=True)          # EUP seed ...
        inv = inv * (2.0 - denom * inv)                  # ... + one Newton step (no divide)
        probs = e * inv

        # Store only the real action lanes (out last dim == full array dim -> legal block).
        o_ref[pl.ds(row0, chunk), :] = probs[:, :action_dim].astype(o_ref.dtype)
        return carry

    lax.fori_loop(0, n_chunks, body, 0)


def policy_network_forward(x, w1, b1, w2p, b2p, *, action_dim,
                           num_tiles=None, chunk=256):
    """softmax(relu(x @ w1 + b1) @ w2 + b2) for a batch of env states -> probs [B, A].

    Expects fc2 params already padded by `prepare_params` (done once, not per call).
    """
    B, S = x.shape
    H = w1.shape[1]
    assert w2p.shape == (H, LANE) and b2p.shape == (1, LANE)

    if num_tiles is None:
        num_tiles = _default_num_tiles()

    # Sub-chunk rows per inner-loop step (multiple of 8 sublanes, capped by the batch).
    chunk = max(8, min(_round_up(chunk, 8), _round_up(B, 8)))
    tile_b = _round_up(pl.cdiv(B, num_tiles), chunk)
    b_padded = tile_b * num_tiles
    if b_padded != B:
        x = jnp.pad(x, ((0, b_padded - B), (0, 0)))

    kernel = functools.partial(_policy_kernel, state_dim=S,
                               action_dim=action_dim, chunk=chunk)

    probs = pl.pallas_call(
        kernel,
        out_shape=jax.ShapeDtypeStruct((b_padded, action_dim), jnp.float32),
        grid_spec=pltpu.PrefetchScalarGridSpec(
            num_scalar_prefetch=0,
            grid=(num_tiles,),
            in_specs=[
                pl.BlockSpec((tile_b, S), lambda i: (i, 0)),    # x: tiled over batch
                pl.BlockSpec((S, H), lambda i: (0, 0)),         # w1: resident full block
                pl.BlockSpec((1, H), lambda i: (0, 0)),         # b1
                pl.BlockSpec((H, LANE), lambda i: (0, 0)),      # w2 (lane-padded)
                pl.BlockSpec((1, LANE), lambda i: (0, 0)),      # b2 (NEG_BIG-padded)
            ],
            out_specs=pl.BlockSpec((tile_b, action_dim), lambda i: (i, 0)),
        ),
        compiler_params=pltpu.CompilerParams(
            dimension_semantics=("parallel",),   # shards the batch across both TCs on v7x
        ),
    )(x, w1, b1, w2p, b2p)

    if b_padded != B:
        probs = probs[:B]
    return probs


def init_params(key, state_dim, hidden_dim, action_dim):
    """Deterministic init mimicking torch.nn.Linear default (uniform +/- 1/sqrt(fan_in))."""
    k1, k2, k3, k4 = jax.random.split(key, 4)
    lim1 = 1.0 / jnp.sqrt(jnp.float32(state_dim))
    lim2 = 1.0 / jnp.sqrt(jnp.float32(hidden_dim))
    w1 = jax.random.uniform(k1, (state_dim, hidden_dim), jnp.float32, -lim1, lim1)
    b1 = jax.random.uniform(k2, (1, hidden_dim), jnp.float32, -lim1, lim1)
    w2 = jax.random.uniform(k3, (hidden_dim, action_dim), jnp.float32, -lim2, lim2)
    b2 = jax.random.uniform(k4, (1, action_dim), jnp.float32, -lim2, lim2)
    return w1, b1, w2, b2


if __name__ == "__main__":
    # CartPole-like sizes: state_dim=4, hidden_dim=32, action_dim=2; a batch of env states
    # per launch (the structural fix: one pallas_call amortizes fixed launch/grid overhead).
    state_dim, hidden_dim, action_dim, batch = 4, 32, 2, 512

    key = jax.random.PRNGKey(0)
    kx, kp = jax.random.split(key)
    x = jax.random.normal(kx, (batch, state_dim), jnp.float32)
    w1, b1, w2, b2 = init_params(kp, state_dim, hidden_dim, action_dim)

    # One-time parameter prep (fc2 lane-padding hoisted out of the per-step forward call).
    w1p, b1p, w2p, b2p, a_dim = prepare_params(w1, b1, w2, b2)

    fwd = jax.jit(functools.partial(policy_network_forward, action_dim=a_dim))
    probs = jax.block_until_ready(fwd(x, w1p, b1p, w2p, b2p))

    # Plain-JAX reference at full f32 precision.
    hp = jax.lax.Precision.HIGHEST
    h_ref = jnp.maximum(jnp.dot(x, w1, precision=hp) + b1, 0.0)
    logits_ref = jnp.dot(h_ref, w2, precision=hp) + b2
    ref = jax.nn.softmax(logits_ref, axis=-1)

    assert probs.shape == (batch, action_dim)
    assert bool(jnp.all(jnp.isfinite(probs)))
    # Tolerance covers MXU default-precision f32 matmul + Newton-refined approx reciprocal.
    assert jnp.allclose(probs, ref, atol=2e-3, rtol=2e-3)
    assert jnp.allclose(jnp.sum(probs, axis=-1), 1.0, atol=1e-3)

    # TODO(synk): Categorical action sampling / Adam updates from the REINFORCE loop are
    # outside this module's forward(); sampling could later be fused into the same kernel.
    print("KERNEL_OK")
</pallas_src>

<mosaic_0001>
module attributes {stable_mosaic.version = 11 : i64} {
  func.func @_policy_kernel(%arg0: i32, %arg1: memref<512x4xf32, #tpu.memory_space<vmem>>, %arg2: memref<4x32xf32, #tpu.memory_space<vmem>>, %arg3: memref<1x32xf32, #tpu.memory_space<vmem>>, %arg4: memref<32x128xf32, #tpu.memory_space<vmem>>, %arg5: memref<1x128xf32, #tpu.memory_space<vmem>>, %arg6: memref<512x2xf32, #tpu.memory_space<vmem>>) attributes {dimension_semantics = [#tpu.dimension_semantics<parallel>], iteration_bounds = array<i64: 1>, scalar_prefetch = 0 : i64, scratch_operands = 0 : i64, tpu.core_type = #tpu.core_type<tc>, window_params = [{transform_indices = @transform_0, window_bounds = array<i64: 512, 4>}, {pipeline_mode = #tpu.pipeline_mode<synchronous>, transform_indices = @transform_1, window_bounds = array<i64: 4, 32>}, {pipeline_mode = #tpu.pipeline_mode<synchronous>, transform_indices = @transform_2, window_bounds = array<i64: 1, 32>}, {pipeline_mode = #tpu.pipeline_mode<synchronous>, transform_indices = @transform_3, window_bounds = array<i64: 32, 128>}, {pipeline_mode = #tpu.pipeline_mode<synchronous>, transform_indices = @transform_4, window_bounds = array<i64: 1, 128>}, {transform_indices = @transform_5, window_bounds = array<i64: 512, 2>}]} {
    %c0 = arith.constant 0 : index
    %c0_0 = arith.constant 0 : index
    %0 = vector.load %arg2[%c0, %c0_0] : memref<4x32xf32, #tpu.memory_space<vmem>>, vector<4x32xf32>
    %c0_1 = arith.constant 0 : index
    %c0_2 = arith.constant 0 : index
    %1 = vector.load %arg3[%c0_1, %c0_2] : memref<1x32xf32, #tpu.memory_space<vmem>>, vector<1x32xf32>
    %2 = vector.shape_cast %1 : vector<1x32xf32> to vector<1x32xf32>
    %3 = vector.broadcast %2 : vector<1x32xf32> to vector<256x32xf32>
    %c0_3 = arith.constant 0 : index
    %c0_4 = arith.constant 0 : index
    %4 = vector.load %arg4[%c0_3, %c0_4] : memref<32x128xf32, #tpu.memory_space<vmem>>, vector<32x128xf32>
    %c0_5 = arith.constant 0 : index
    %c0_6 = arith.constant 0 : index
    %5 = vector.load %arg5[%c0_5, %c0_6] : memref<1x128xf32, #tpu.memory_space<vmem>>, vector<1x128xf32>
    %c0_i32 = arith.constant 0 : i32
    %c2_i32 = arith.constant 2 : i32
    %6 = arith.addi %c0_i32, %c2_i32 : i32
    %c1_i32 = arith.constant 1 : i32
    scf.for %arg7 = %c0_i32 to %6 step %c1_i32  : i32 {
      %c256_i32 = arith.constant 256 : i32
      %7 = arith.muli %arg7, %c256_i32 : i32
      %8 = tpu.assume_multiple %7, 256 : i32
      %9 = arith.index_cast %8 : i32 to index
      %c0_8 = arith.constant 0 : index
      %10 = vector.load %arg1[%9, %c0_8] : memref<512x4xf32, #tpu.memory_space<vmem>>, vector<256x1xf32>
      %11 = vector.extract_strided_slice %0 {offsets = [0, 0], sizes = [1, 32], strides = [1, 1]} : vector<4x32xf32> to vector<1x32xf32>
      %12 = vector.broadcast %10 : vector<256x1xf32> to vector<256x32xf32>
      %13 = vector.broadcast %11 : vector<1x32xf32> to vector<256x32xf32>
      %14 = arith.mulf %12, %13 : vector<256x32xf32>
      %15 = arith.addf %3, %14 : vector<256x32xf32>
      %16 = arith.index_cast %8 : i32 to index
      %c1 = arith.constant 1 : index
      %17 = vector.load %arg1[%16, %c1] : memref<512x4xf32, #tpu.memory_space<vmem>>, vector<256x1xf32>
      %18 = vector.extract_strided_slice %0 {offsets = [1, 0], sizes = [1, 32], strides = [1, 1]} : vector<4x32xf32> to vector<1x32xf32>
      %19 = vector.broadcast %17 : vector<256x1xf32> to vector<256x32xf32>
      %20 = vector.broadcast %18 : vector<1x32xf32> to vector<256x32xf32>
      %21 = arith.mulf %19, %20 : vector<256x32xf32>
      %22 = arith.addf %15, %21 : vector<256x32xf32>
      %23 = arith.index_cast %8 : i32 to index
      %c2 = arith.constant 2 : index
      %24 = vector.load %arg1[%23, %c2] : memref<512x4xf32, #tpu.memory_space<vmem>>, vector<256x1xf32>
      %25 = vector.extract_strided_slice %0 {offsets = [2, 0], sizes = [1, 32], strides = [1, 1]} : vector<4x32xf32> to vector<1x32xf32>
      %26 = vector.broadcast %24 : vector<256x1xf32> to vector<256x32xf32>
      %27 = vector.broadcast %25 : vector<1x32xf32> to vector<256x32xf32>
      %28 = arith.mulf %26, %27 : vector<256x32xf32>
      %29 = arith.addf %22, %28 : vector<256x32xf32>
      %30 = arith.index_cast %8 : i32 to index
      %c3 = arith.constant 3 : index
      %31 = vector.load %arg1[%30, %c3] : memref<512x4xf32, #tpu.memory_space<vmem>>, vector<256x1xf32>
      %32 = vector.extract_strided_slice %0 {offsets = [3, 0], sizes = [1, 32], strides = [1, 1]} : vector<4x32xf32> to vector<1x32xf32>
      %33 = vector.broadcast %31 : vector<256x1xf32> to vector<256x32xf32>
      %34 = vector.broadcast %32 : vector<1x32xf32> to vector<256x32xf32>
      %35 = arith.mulf %33, %34 : vector<256x32xf32>
      %36 = arith.addf %29, %35 : vector<256x32xf32>
      %cst = arith.constant 0.000000e+00 : f32
      %37 = vector.broadcast %cst : f32 to vector<256x32xf32>
      %38 = arith.maximumf %36, %37 : vector<256x32xf32>
      %cst_9 = arith.constant dense<0.000000e+00> : vector<256x128xf32>
      %39 = tpu.matmul %38, %4, %cst_9 {dimension_numbers = #tpu.dot_dimension_numbers<[1], [0], [0], [1], [0, 0, 1, 1], [], []>} : vector<256x32xf32>, vector<32x128xf32>, vector<256x128xf32> -> vector<256x128xf32>
      %40 = vector.broadcast %5 : vector<1x128xf32> to vector<256x128xf32>
      %41 = arith.addf %39, %40 : vector<256x128xf32>
      %cst_10 = arith.constant dense<0xFF800000> : vector<256xf32>
      %42 = vector.multi_reduction <maximumf>, %41, %cst_10 [1] : vector<256x128xf32> to vector<256xf32>
      %43 = vector.shape_cast %42 : vector<256xf32> to vector<256x1xf32>
      %44 = vector.broadcast %43 : vector<256x1xf32> to vector<256x128xf32>
      %45 = arith.subf %41, %44 : vector<256x128xf32>
      %46 = math.exp %45 : vector<256x128xf32>
      %cst_11 = arith.constant dense<0.000000e+00> : vector<256xf32>
      %47 = vector.multi_reduction <add>, %46, %cst_11 [1] : vector<256x128xf32> to vector<256xf32>
      %48 = vector.shape_cast %47 : vector<256xf32> to vector<256x1xf32>
      %49 = tpu.reciprocal %48 {approx = true} : vector<256x1xf32> -> vector<256x1xf32>
      %50 = arith.mulf %48, %49 : vector<256x1xf32>
      %cst_12 = arith.constant 2.000000e+00 : f32
      %51 = vector.broadcast %cst_12 : f32 to vector<256x1xf32>
      %52 = arith.subf %51, %50 : vector<256x1xf32>
      %53 = arith.mulf %49, %52 : vector<256x1xf32>
      %54 = vector.broadcast %53 : vector<256x1xf32> to vector<256x128xf32>
      %55 = arith.mulf %46, %54 : vector<256x128xf32>
      %56 = vector.extract_strided_slice %55 {offsets = [0, 0], sizes = [256, 2], strides = [1, 1]} : vector<256x128xf32> to vector<256x2xf32>
      %57 = arith.index_cast %8 : i32 to index
      %c0_13 = arith.constant 0 : index
      %58 = vector.load %arg6[%57, %c0_13] : memref<512x2xf32, #tpu.memory_space<vmem>>, vector<256x2xf32>
      tpu.vector_store %arg6[%57, %c0_13], %56 {strides = array<i32>} : memref<512x2xf32, #tpu.memory_space<vmem>>, vector<256x2xf32>,
    }
    %c2_i32_7 = arith.constant 2 : i32
    return
  }
  func.func @transform_0(%arg0: i32) -> (i32, i32) {
    %c0_i32 = arith.constant 0 : i32
    %c0_i32_0 = arith.constant 0 : i32
    return %arg0, %c0_i32 : i32, i32
  }
  func.func @transform_1(%arg0: i32) -> (i32, i32) {
    %c0_i32 = arith.constant 0 : i32
    %c0_i32_0 = arith.constant 0 : i32
    %c0_i32_1 = arith.constant 0 : i32
    return %c0_i32, %c0_i32_0 : i32, i32
  }
  func.func @transform_2(%arg0: i32) -> (i32, i32) {
    %c0_i32 = arith.constant 0 : i32
    %c0_i32_0 = arith.constant 0 : i32
    %c0_i32_1 = arith.constant 0 : i32
    return %c0_i32, %c0_i32_0 : i32, i32
  }
  func.func @transform_3(%arg0: i32) -> (i32, i32) {
    %c0_i32 = arith.constant 0 : i32
    %c0_i32_0 = arith.constant 0 : i32
    %c0_i32_1 = arith.constant 0 : i32
    return %c0_i32, %c0_i32_0 : i32, i32
  }
  func.func @transform_4(%arg0: i32) -> (i32, i32) {
    %c0_i32 = arith.constant 0 : i32
    %c0_i32_0 = arith.constant 0 : i32
    %c0_i32_1 = arith.constant 0 : i32
    return %c0_i32, %c0_i32_0 : i32, i32
  }
  func.func @transform_5(%arg0: i32) -> (i32, i32) {
    %c0_i32 = arith.constant 0 : i32
    %c0_i32_0 = arith.constant 0 : i32
    return %arg0, %c0_i32 : i32, i32
  }
}

</mosaic_0001>

<bundles_post_ra>
// kernel: policy_network_forward.1
= control target key start
LH: loop header
LB: loop body
LE: loop exit
PB: predicated region body
PF: predicated region fallthrough
CT: control target
= control target key end

     0   :  { %s2072_s30 = smov 0   ;;  %s3163_s0 = inlined_call_operand.vmem [shape: f32[512,4], index: 0, kind: input, shape index: {}]   ;;  %s3164_s1 = inlined_call_operand.vmem [shape: f32[4,32], index: 1, kind: input, shape index: {}]   ;;  %s3165_s2 = inlined_call_operand.vmem [shape: f32[1,32], index: 2, kind: input, shape index: {}]   ;;  %s3166_s3 = inlined_call_operand.vmem [shape: f32[32,128], index: 3, kind: input, shape index: {}]   ;;  %s3167_s4 = inlined_call_operand.vmem [shape: f32[1,128], index: 4, kind: input, shape index: {}]   ;;  %s3168_s5 = inlined_call_operand.vmem [shape: f32[512,2], index: 5, kind: output, shape index: {}]  }
   0x1   :  { %v2040_v0 = vld [vmem:[%s3164_s1] sm:$0xf]  ;;  %v2055_v3 = vld [vmem:[%s3166_s3 + $0x8] sm:$0xff]  ;;  %v2060_v4 = vld [vmem:[%s3166_s3 + $0x10] sm:$0xff] }
   0x2   :  { %3182 = vst [vmem:[#allocation2_spill] sm:$0xff] %v2040_v0  ;;  %v2045_v1 = vld [vmem:[%s3165_s2] ss:$0 sm:$0xff]  ;;  %3184 = vst [vmem:[#allocation4_spill] sm:$0xff] %v2055_v3  ;;  %v2065_v5 = vld [vmem:[%s3166_s3 + $0x18] sm:$0xff] }
   0x3   :  { %v2050_v2 = vld [vmem:[%s3166_s3] sm:$0xff]  ;;  %3185 = vst [vmem:[#allocation5_spill] sm:$0xff] %v2060_v4  ;;  %3186 = vst [vmem:[#allocation6_spill] sm:$0xff] %v2065_v5 }
   0x4   :  { %3183 = vst [vmem:[#allocation3_spill] sm:$0xff] %v2050_v2  ;;  %v2070_v6 = vld [vmem:[%s3167_s4] ss:$0 sm:$0xff] }
   0x5   :  { %3187 = vst [vmem:[#allocation7_spill] sm:$0xff] %v2070_v6 }
   0x6 LB: > { %v2003_v7 = vmov 0   ;;  %s1681_s3 = sshll.u32 %s2001_s30, 8  ;;  %v3171_v40 = vmov 1   ;;  %v3169_v41 = vmov 2   ;;  %v3173_v42 = vmov 3   ;;  %s38_s30 = sadd.s32 1, %s2001_s30   ;;  %s2001_s30 = sphi %s2072_s30, %s38_s30  }
   0x7   : > { %1828 = vset.pattern.permute.xlu1 %v2003_v7  ;;  %1827 = vset.pattern.permute.xlu0 %v2003_v7  ;;  %s2087_s7 = scalar_lea.vmem %s3163_s0, %s1681_s3  ;;  %v233_v6 = vlaneseq  ;;  %vm927_vm0 = vcmask 261120   ;;  %s3035_s10 = scalar_lea.vmem %s3168_s5, %s1681_s3  ;;  %vm1634_vm1 = vcmask 15360  }
   0x8   : > { %v2092_v8 = vld [vmem:[%s2087_s7 + $0x10] sm:$0xff]  ;;  %v2095_v9 = vld [vmem:[%s2087_s7] sm:$0xff]  ;;  %v2102_v10 = vld [vmem:[%s2087_s7 + $0x18] sm:$0xff]  ;;  %p35_p0 = scmp.ge.s32.totalorder %s38_s30, 2  }
   0x9   : > { %v3188_v0 = vld [vmem:[#allocation2_spill] sm:$0xff]  ;;  %v3191_v3 = vld [vmem:[#allocation4_spill] sm:$0xff]  ;;  %85 = vperm.xlu1 %1828, %v2092_v8   ;;  %75 = vperm.xlu0 %1827, %v2095_v9   ;;  %v2105_v11 = vld [vmem:[%s2087_s7 + $0x8] sm:$0xff] }
   0xa   : > { %v3189_v5 = vld [vmem:[#allocation6_spill] sm:$0xff]  ;;  %v3190_v4 = vld [vmem:[#allocation5_spill] sm:$0xff]  ;;  %v2116_v12 = vld [vmem:[%s2087_s7 + $0x28] sm:$0xff] }
   0xb   : > { %v3192_v2 = vld [vmem:[#allocation3_spill] sm:$0xff]  ;;  %1751 = vmatprep.subr.mxu0 %v3189_v5  ;;  %1807 = vmatprep.subr.mxu1 %v3189_v5  ;;  %v2119_v13 = vld [vmem:[%s2087_s7 + $0x20] sm:$0xff]  ;;  %v2126_v14 = vld [vmem:[%s2087_s7 + $0x38] sm:$0xff] }
   0xc   : > { %1752 = vmatpush3.msra.mxu0 %v3189_v5  ;;  %1811 = vmatpush3.msra.mxu1 %v3189_v5  ;;  %v2129_v15 = vld [vmem:[%s2087_s7 + $0x30] sm:$0xff]  ;;  %v2134_v16 = vld [vmem:[%s2087_s7 + $0x48] sm:$0xff]  ;;  %v2137_v17 = vld [vmem:[%s2087_s7 + $0x40] sm:$0xff] }
   0xd   : > { %1753 = vmatprep.subr.mxu0 %v3190_v4  ;;  %1808 = vmatprep.subr.mxu1 %v3190_v4  ;;  %v2142_v18 = vld [vmem:[%s2087_s7 + $0x58] sm:$0xff]  ;;  %v2145_v19 = vld [vmem:[%s2087_s7 + $0x50] sm:$0xff]  ;;  %v2150_v20 = vld [vmem:[%s2087_s7 + $0x68] sm:$0xff] }
   0xe   : > { %1754 = vmatpush3.msra.mxu0 %v3190_v4  ;;  %1812 = vmatpush3.msra.mxu1 %v3190_v4  ;;  %v2153_v21 = vld [vmem:[%s2087_s7 + $0x60] sm:$0xff]  ;;  %v2158_v22 = vld [vmem:[%s2087_s7 + $0x78] sm:$0xff]  ;;  %v2161_v23 = vld [vmem:[%s2087_s7 + $0x70] sm:$0xff] }
   0xf   : > { %1755 = vmatprep.subr.mxu0 %v3191_v3  ;;  %1809 = vmatprep.subr.mxu1 %v3191_v3  ;;  %3193 = vst [vmem:[#allocation8_spill] sm:$0xff] %v2161_v23  ;;  %v2166_v24 = vld [vmem:[%s2087_s7 + $0x88] sm:$0xff]  ;;  %v57_v25 = vld [vmem:[%s2087_s7 + $0x80] sm:$0xff]  ;;  %v2171_v26 = vld [vmem:[%s2087_s7 + $0x98] sm:$0xff] }
  0x10   : > { %1756 = vmatpush3.msra.mxu0 %v3191_v3  ;;  %1813 = vmatpush3.msra.mxu1 %v3191_v3  ;;  %v2174_v27 = vld [vmem:[%s2087_s7 + $0x90] sm:$0xff]  ;;  %v2179_v28 = vld [vmem:[%s2087_s7 + $0xa8] sm:$0xff]  ;;  %v2182_v29 = vld [vmem:[%s2087_s7 + $0xa0] sm:$0xff] }
  0x11   : > { %1757 = vmatprep.subr.mxu0 %v3192_v2  ;;  %1810 = vmatprep.subr.mxu1 %v3192_v2  ;;  %v2187_v30 = vld [vmem:[%s2087_s7 + $0xb8] sm:$0xff]  ;;  %v2190_v31 = vld [vmem:[%s2087_s7 + $0xb0] sm:$0xff]  ;;  %v2195_v32 = vld [vmem:[%s2087_s7 + $0xc8] sm:$0xff] }
  0x12   : > { %90 = vperm.xlu1 %1828, %v2102_v10   ;;  %80 = vperm.xlu0 %1827, %v2105_v11   ;;  %v2198_v33 = vld [vmem:[%s2087_s7 + $0xc0] sm:$0xff]  ;;  %v2203_v34 = vld [vmem:[%s2087_s7 + $0xd8] sm:$0xff]  ;;  %v2206_v35 = vld [vmem:[%s2087_s7 + $0xd0] sm:$0xff] }
  0x13   : > { %1758 = vmatpush3.msra.mxu0 %v3192_v2  ;;  %1814 = vmatpush3.msra.mxu1 %v3192_v2  ;;  %v2211_v36 = vld [vmem:[%s2087_s7 + $0xe8] sm:$0xff]  ;;  %v2214_v37 = vld [vmem:[%s2087_s7 + $0xe0] sm:$0xff]  ;;  %v2219_v38 = vld [vmem:[%s2087_s7 + $0xf8] sm:$0xff] }
  0x14   : > { %v2222_v39 = vld [vmem:[%s2087_s7 + $0xf0] sm:$0xff] }
  0x16   : > { %100 = vperm.xlu1 %1828, %v2116_v12   ;;  %95 = vperm.xlu0 %1827, %v2119_v13  }
  0x1a   : > { %110 = vperm.xlu1 %1828, %v2126_v14   ;;  %105 = vperm.xlu0 %1827, %v2129_v15  }
  0x1e   : > { %120 = vperm.xlu1 %1828, %v2134_v16   ;;  %115 = vperm.xlu0 %1827, %v2137_v17  }
  0x22   : > { %130 = vperm.xlu1 %1828, %v2142_v18   ;;  %125 = vperm.xlu0 %1827, %v2145_v19  }
  0x26   : > { %140 = vperm.xlu1 %1828, %v2150_v20   ;;  %135 = vperm.xlu0 %1827, %v2153_v21  }
  0x2a   : > { %150 = vperm.xlu1 %1828, %v2158_v22   ;;  %145 = vperm.xlu0 %1827, %v2161_v23  }
  0x2e   : > { %160 = vperm.xlu1 %1828, %v2166_v24   ;;  %155 = vperm.xlu0 %1827, %v57_v25  }
  0x32   : > { %170 = vperm.xlu1 %1828, %v2171_v26   ;;  %165 = vperm.xlu0 %1827, %v2174_v27  }
  0x36   : > { %180 = vperm.xlu1 %1828, %v2179_v28   ;;  %175 = vperm.xlu0 %1827, %v2182_v29  }
  0x3a   : > { %190 = vperm.xlu1 %1828, %v2187_v30   ;;  %185 = vperm.xlu0 %1827, %v2190_v31  }
  0x3e   : > { %200 = vperm.xlu1 %1828, %v2195_v32   ;;  %195 = vperm.xlu0 %1827, %v2198_v33  }
  0x42   : > { %210 = vperm.xlu1 %1828, %v2203_v34   ;;  %205 = vperm.xlu0 %1827, %v2206_v35  }
  0x46   : > { %220 = vperm.xlu1 %1828, %v2211_v36   ;;  %215 = vperm.xlu0 %1827, %v2214_v37  }
  0x4a   : > { %230 = vperm.xlu1 %1828, %v2219_v38   ;;  %225 = vperm.xlu0 %1827, %v2222_v39  }
  0x4e   : > { %1830 = vset.pattern.permute.xlu1 %v3171_v40  ;;  %1829 = vset.pattern.permute.xlu0 %v3171_v40 }
  0x4f   : > { %306 = vperm.xlu1 %1830, %v2105_v11   ;;  %302 = vperm.xlu0 %1829, %v2095_v9  }
  0x53   : > { %310 = vperm.xlu1 %1830, %v2092_v8   ;;  %314 = vperm.xlu0 %1829, %v2102_v10  }
  0x57   : > { %318 = vperm.xlu1 %1830, %v2119_v13   ;;  %322 = vperm.xlu0 %1829, %v2116_v12  }
  0x5b   : > { %326 = vperm.xlu1 %1830, %v2129_v15   ;;  %330 = vperm.xlu0 %1829, %v2126_v14  }
  0x5f   : > { %334 = vperm.xlu1 %1830, %v2137_v17   ;;  %338 = vperm.xlu0 %1829, %v2134_v16  }
  0x63   : > { %342 = vperm.xlu1 %1830, %v2145_v19   ;;  %346 = vperm.xlu0 %1829, %v2142_v18  }
  0x67   : > { %366 = vperm.xlu1 %1830, %v57_v25   ;;  %370 = vperm.xlu0 %1829, %v2166_v24  }
  0x6b   : > { %1831 = vset.pattern.permute.xlu1 %v3169_v41  ;;  %374 = vperm.xlu0 %1829, %v2174_v27  }
  0x6c   : > { %498 = vperm.xlu1 %1831, %v2095_v9  }
  0x6f   : > { %378 = vperm.xlu0 %1829, %v2171_v26  }
  0x70   : > { %502 = vperm.xlu1 %1831, %v2105_v11  }
  0x73   : > { %414 = vperm.xlu0 %1829, %v2214_v37  }
  0x74   : > { %566 = vperm.xlu1 %1831, %v2166_v24  }
  0x77   : > { %354 = vperm.xlu0 %1829, %v2150_v20  }
  0x78   : > { %1832 = vset.pattern.permute.xlu1 %v3173_v42 }
  0x79   : > { %694 = vperm.xlu1 %1832, %v2095_v9  }
  0x7b   : > { %358 = vperm.xlu0 %1829, %v2161_v23  }
  0x7d   : > { %758 = vperm.xlu1 %1832, %v57_v25  }
  0x7f   : > { %1859 = vset.pattern.permute.xlu0 %v3169_v41 }
  0x80   : > { %562 = vperm.xlu0 %1859, %v57_v25  }
  0x81   : > { %698 = vperm.xlu1 %1832, %v2105_v11  }
  0x84   : > { %510 = vperm.xlu0 %1859, %v2102_v10   ;;  %v2258_v43 = vpop.permute.xlu1 %85  ;;  %v2260_v44 = vpop.permute.xlu0 %75 }
  0x85   : > { %1833 = vset.pattern.permute.xlu1 %v3169_v41 }
  0x86   : > { %506 = vperm.xlu1 %1833, %v2092_v8  }
  0x88   : > { %514 = vperm.xlu0 %1859, %v2119_v13  }
  0x8a   : > { %570 = vperm.xlu1 %1833, %v2174_v27  }
  0x8c   : > { %582 = vperm.xlu0 %1859, %v2179_v28  }
  0x8d   : > { %v2264_v45 = vpop.permute.xlu1 %90  ;;  %v2266_v46 = vpop.permute.xlu0 %80 }
  0x8e   : > { %574 = vperm.xlu1 %1833, %v2171_v26  }
  0x90   : > { %522 = vperm.xlu0 %1859, %v2129_v15  }
  0x91   : > { %v2270_v47 = vpop.permute.xlu1 %100  ;;  %v2272_v48 = vpop.permute.xlu0 %95 }
  0x92   : > { %1834 = vset.pattern.permute.xlu1 %v3171_v40 }
  0x93   : > { %382 = vperm.xlu1 %1834, %v2182_v29  }
  0x94   : > { %590 = vperm.xlu0 %1859, %v2187_v30  }
  0x95   : > { %v2277_v49 = vpop.permute.xlu1 %110  ;;  %v2279_v50 = vpop.permute.xlu0 %105 }
  0x97   : > { %1835 = vset.pattern.permute.xlu1 %v3173_v42 }
  0x98   : > { %766 = vperm.xlu1 %1835, %v2174_v27   ;;  %530 = vperm.xlu0 %1859, %v2137_v17  }
  0x99   : > { %v2284_v51 = vpop.permute.xlu1 %120  ;;  %v2286_v52 = vpop.permute.xlu0 %115 }
  0x9a   : > { %3194 = vst [vmem:[#allocation9_spill] sm:$0xff] %v2284_v51 }
  0x9c   : > { %1836 = vset.pattern.permute.xlu1 %v3171_v40  ;;  %598 = vperm.xlu0 %1859, %v2195_v32  }
  0x9d   : > { %v2290_v53 = vpop.permute.xlu1 %130  ;;  %386 = vperm.xlu1 %1836, %v2179_v28   ;;  %v2293_v54 = vpop.permute.xlu0 %125 }
  0x9e   : > { %3195 = vst [vmem:[#allocation10_spill] sm:$0xff] %v2290_v53  ;;  %3196 = vst [vmem:[#allocation11_spill] sm:$0xff] %v2293_v54 }
  0xa0   : > { %538 = vperm.xlu0 %1859, %v2145_v19  }
  0xa1   : > { %v2296_v55 = vpop.permute.xlu1 %140  ;;  %1837 = vset.pattern.permute.xlu1 %v3173_v42  ;;  %v2299_v56 = vpop.permute.xlu0 %135 }
  0xa2   : > { %3197 = vst [vmem:[#allocation12_spill] sm:$0xff] %v2296_v55  ;;  %3198 = vst [vmem:[#allocation13_spill] sm:$0xff] %v2299_v56  ;;  %770 = vperm.xlu1 %1837, %v2171_v26  }
  0xa4   : > { %606 = vperm.xlu0 %1859, %v2203_v34  }
  0xa5   : > { %v2303_v57 = vpop.permute.xlu1 %150  ;;  %v2305_v58 = vpop.permute.xlu0 %145 }
  0xa6   : > { %3199 = vst [vmem:[#allocation14_spill] sm:$0xff] %v2303_v57  ;;  %1838 = vset.pattern.permute.xlu1 %v3169_v41 }
  0xa7   : > { %578 = vperm.xlu1 %1838, %v2182_v29  }
  0xa8   : > { %610 = vperm.xlu0 %1859, %v2214_v37  }
  0xa9   : > { %v2310_v59 = vpop.permute.xlu1 %160  ;;  %v2312_v60 = vpop.permute.xlu0 %155 }
  0xab   : > { %518 = vperm.xlu1 %1838, %v2116_v12  }
  0xac   : > { %554 = vperm.xlu0 %1859, %v2161_v23  }
  0xad   : > { %v2316_v61 = vpop.permute.xlu1 %170  ;;  %v2318_v62 = vpop.permute.xlu0 %165 }
  0xaf   : > { %1839 = vset.pattern.permute.xlu1 %v3171_v40 }
  0xb0   : > { %390 = vperm.xlu1 %1839, %v2190_v31   ;;  %622 = vperm.xlu0 %1859, %v2219_v38  }
  0xb1   : > { %v2323_v63 = vpop.permute.xlu1 %180  ;;  %v2325_v7 = vpop.permute.xlu0 %175 }
  0xb4   : > { %1840 = vset.pattern.permute.xlu1 %v3173_v42  ;;  %1865 = vset.pattern.permute.xlu0 %v3173_v42 }
  0xb5   : > { %v2329_v9 = vpop.permute.xlu1 %190  ;;  %774 = vperm.xlu1 %1840, %v2182_v29   ;;  %762 = vperm.xlu0 %1865, %v2166_v24   ;;  %v2333_v11 = vpop.permute.xlu0 %185 }
  0xb6   : > { %3200 = vst [vmem:[#allocation15_spill] sm:$0xff] %v2329_v9 }
  0xb9   : > { %v2335_v25 = vpop.permute.xlu1 %200  ;;  %1841 = vset.pattern.permute.xlu1 %v3171_v40  ;;  %702 = vperm.xlu0 %1865, %v2092_v8   ;;  %v2339_v26 = vpop.permute.xlu0 %195  ;;  %v3206_v8 = vmov 2  }
  0xba   : > { %3201 = vst [vmem:[#allocation16_spill] sm:$0xff] %v2335_v25  ;;  %3202 = vst [vmem:[#allocation17_spill] sm:$0xff] %v2339_v26  ;;  %394 = vperm.xlu1 %1841, %v2187_v30  }
  0xbd   : > { %v2342_v27 = vpop.permute.xlu1 %210  ;;  %706 = vperm.xlu0 %1865, %v2102_v10   ;;  %v2345_v41 = vpop.permute.xlu0 %205 }
  0xbe   : > { %3203 = vst [vmem:[#allocation18_spill] sm:$0xff] %v2342_v27  ;;  %3204 = vst [vmem:[#allocation19_spill] sm:$0xff] %v2345_v41  ;;  %1842 = vset.pattern.permute.xlu1 %v3173_v42 }
  0xbf   : > { %778 = vperm.xlu1 %1842, %v2179_v28  }
  0xc1   : > { %v2349_v24 = vpop.permute.xlu1 %220  ;;  %710 = vperm.xlu0 %1865, %v2119_v13   ;;  %v2352_v29 = vpop.permute.xlu0 %215  ;;  %v3209_v13 = vmov 1  }
  0xc2   : > { %3205 = vst [vmem:[#allocation20_spill] sm:$0xff] %v2349_v24  ;;  %v234_v24 = vshrl.u32 %v233_v6, 7 }
  0xc3   : > { %1843 = vset.pattern.permute.xlu1 %v3206_v8 }
  0xc4   : > { %586 = vperm.xlu1 %1843, %v2190_v31   ;;  %v235_v55 = vsub.s32 0, %v234_v24  ;;  %v431_v6 = vsub.s32 1, %v234_v24  ;;  %v823_v26 = vsub.s32 3, %v234_v24 }
  0xc5   : > { %v2356_v40 = vpop.permute.xlu1 %230  ;;  %714 = vperm.xlu0 %1865, %v2116_v12   ;;  %v2359_v10 = vpop.permute.xlu0 %225  ;;  %v3210_v12 = vmov 3  }
  0xc6   : > { %3207 = vst [vmem:[#allocation21_spill] sm:$0xff] %v2356_v40  ;;  %3208 = vst [vmem:[#allocation22_spill] sm:$0xff] %v2359_v10  ;;  %v2432_v9 = vrot.slane %v3188_v0, %v823_v26 }
  0xc8   : > { %526 = vperm.xlu1 %1843, %v2126_v14  }
  0xc9   : > { %718 = vperm.xlu0 %1865, %v2129_v15  }
  0xca   : > { %v2363_v28 = vpop.permute.xlu1 %306  ;;  %v303_v42 = vpop.permute.xlu0 %302 }
  0xcc   : > { %1844 = vset.pattern.permute.xlu1 %v3209_v13 }
  0xcd   : > { %398 = vperm.xlu1 %1844, %v2198_v33   ;;  %722 = vperm.xlu0 %1865, %v2126_v14  }
  0xce   : > { %v2368_v2 = vpop.permute.xlu1 %310  ;;  %v2370_v3 = vpop.permute.xlu0 %314 }
  0xd1   : > { %1845 = vset.pattern.permute.xlu1 %v3210_v12  ;;  %726 = vperm.xlu0 %1865, %v2137_v17  }
  0xd2   : > { %v2374_v4 = vpop.permute.xlu1 %318  ;;  %782 = vperm.xlu1 %1845, %v2190_v31   ;;  %v2377_v15 = vpop.permute.xlu0 %322 }
  0xd5   : > { %730 = vperm.xlu0 %1865, %v2134_v16  }
  0xd6   : > { %v2380_v5 = vpop.permute.xlu1 %326  ;;  %1846 = vset.pattern.permute.xlu1 %v3209_v13  ;;  %v2383_v14 = vpop.permute.xlu0 %330 }
  0xd7   : > { %402 = vperm.xlu1 %1846, %v2195_v32  }
  0xd9   : > { %738 = vperm.xlu0 %1865, %v2142_v18  }
  0xda   : > { %v2387_v57 = vpop.permute.xlu1 %334  ;;  %v2389_v17 = vpop.permute.xlu0 %338 }
  0xdb   : > { %3211 = vst [vmem:[#allocation23_spill] sm:$0xff] %v2387_v57  ;;  %3212 = vst [vmem:[#allocation24_spill] sm:$0xff] %v2389_v17  ;;  %1847 = vset.pattern.permute.xlu1 %v3210_v12 }
  0xdc   : > { %786 = vperm.xlu1 %1847, %v2187_v30  }
  0xdd   : > { %806 = vperm.xlu0 %1865, %v2214_v37   ;;  %v2408_v37 = vrot.slane %v3188_v0, %v235_v55 }
  0xde   : > { %v2394_v31 = vpop.permute.xlu1 %342  ;;  %v2396_v10 = vpop.permute.xlu0 %346 }
  0xdf   : > { %3213 = vst [vmem:[#allocation25_spill] sm:$0xff] %v2394_v31  ;;  %3214 = vst [vmem:[#allocation26_spill] sm:$0xff] %v2396_v10  ;;  %v237_v41 = vmul.f32 %v2408_v37, %v2260_v44  ;;  %v627_v31 = vsub.s32 2, %v234_v24  ;;  %v253_v24 = vmul.f32 %v2408_v37, %v2312_v60 }
  0xe0   : > { %1848 = vset.pattern.permute.xlu1 %v3206_v8 }
  0xe1   : > { %594 = vperm.xlu1 %1848, %v2198_v33   ;;  %746 = vperm.xlu0 %1865, %v2150_v20   ;;  %v269_v53 = vadd.f32 %v2045_v1, %v237_v41  ;;  %v2422_v25 = vrot.slane %v3188_v0, %v627_v31 }
  0xe2   : > { %v367_v40 = vpop.permute.xlu1 %366  ;;  %v2401_v56 = vpop.permute.xlu0 %370 }
  0xe5   : > { %534 = vperm.xlu1 %1848, %v2134_v16   ;;  %814 = vperm.xlu0 %1865, %v2222_v39   ;;  %v2417_v16 = vrot.slane %v3188_v0, %v431_v6 }
  0xe6   : > { %v2405_v30 = vpop.permute.xlu0 %374 }
  0xe7   : > { %v499_v27 = vpop.permute.xlu1 %498  ;;  %v433_v55 = vmul.f32 %v2417_v16, %v303_v42  ;;  %v238_v42 = vmul.f32 %v2408_v37, %v2266_v46  ;;  %v285_v46 = vadd.f32 %v2045_v1, %v253_v24 }
  0xe8   : > { %v629_v6 = vmul.f32 %v2422_v25, %v499_v27 }
  0xe9   : > { %1849 = vset.pattern.permute.xlu1 %v3209_v13  ;;  %v465_v51 = vadd.f32 %v433_v55, %v269_v53  ;;  %v270_v26 = vadd.f32 %v2045_v1, %v238_v42  ;;  %v434_v55 = vmul.f32 %v2417_v16, %v2363_v28 }
  0xea   : > { %406 = vperm.xlu1 %1849, %v2206_v35   ;;  %v2414_v10 = vpop.permute.xlu0 %378 }
  0xeb   : > { %v503_v54 = vpop.permute.xlu1 %502  ;;  %v661_v31 = vadd.f32 %v629_v6, %v465_v51 }
  0xec   : > { %v630_v51 = vmul.f32 %v2422_v25, %v503_v54 }
  0xee   : > { %1850 = vset.pattern.permute.xlu1 %v3210_v12  ;;  %v2425_v44 = vpop.permute.xlu0 %414 }
  0xef   : > { %790 = vperm.xlu1 %1850, %v2198_v33   ;;  %v2428_v17 = vpop.permute.xlu1 %566 }
  0xf2   : > { %v2434_v41 = vpop.permute.xlu0 %354 }
  0xf3   : > { %3215 = vst [vmem:[#allocation27_spill] sm:$0xff] %v2434_v41  ;;  %1851 = vset.pattern.permute.xlu1 %v3209_v13  ;;  %v449_v41 = vmul.f32 %v2417_v16, %v367_v40 }
  0xf4   : > { %410 = vperm.xlu1 %1851, %v2203_v34   ;;  %v695_v33 = vpop.permute.xlu1 %694 }
  0xf5   : > { %v825_v53 = vmul.f32 %v2432_v9, %v695_v33  ;;  %v466_v33 = vadd.f32 %v434_v55, %v270_v26  ;;  %v481_v23 = vadd.f32 %v449_v41, %v285_v46 }
  0xf6   : > { %v2443_v27 = vpop.permute.xlu0 %358 }
  0xf7   : > { %v857_v0 = vadd.f32 %v825_v53, %v661_v31  ;;  %v662_v24 = vadd.f32 %v630_v51, %v466_v33 }
  0xf8   : > { %1852 = vset.pattern.permute.xlu1 %v3210_v12  ;;  %v759_v60 = vpop.permute.xlu1 %758 }
  0xf9   : > { %794 = vperm.xlu1 %1852, %v2195_v32   ;;  %v889_v6 = vmax.f32 %v857_v0, 0.0  ;;  %v841_v53 = vmul.f32 %v2432_v9, %v759_v60 }
  0xfb   : > { %1759 = vmatprep.mubr.msk.f32.mxu0 %vm927_vm0, %v889_v6  ;;  %v563_v42 = vpop.permute.xlu0 %562 }
  0xfc   : > { %v645_v28 = vmul.f32 %v2422_v25, %v563_v42  ;;  %v699_v31 = vpop.permute.xlu1 %698 }
  0xfd   : > { %v826_v40 = vmul.f32 %v2432_v9, %v699_v31  ;;  %1853 = vset.pattern.permute.xlu1 %v3206_v8 }
  0xfe   : > { %v677_v57 = vadd.f32 %v645_v28, %v481_v23  ;;  %602 = vperm.xlu1 %1853, %v2206_v35  }
  0xff   : > { %v858_v32 = vadd.f32 %v826_v40, %v662_v24  ;;  %v2459_v0 = vpop.permute.xlu0 %510 }
 0x100   : > { %v873_v54 = vadd.f32 %v841_v53, %v677_v57  ;;  %v251_v53 = vmul.f32 %v2408_v37, %v2305_v58  ;;  %v255_v58 = vmul.f32 %v2408_v37, %v2318_v62 }
 0x101   : > { %v890_v26 = vmax.f32 %v858_v32, 0.0  ;;  %v2461_v55 = vpop.permute.xlu1 %506 }
 0x102   : > { %542 = vperm.xlu1 %1853, %v2142_v18   ;;  %v905_v41 = vmax.f32 %v873_v54, 0.0  ;;  %v287_v62 = vadd.f32 %v2045_v1, %v255_v58  ;;  %v241_v58 = vmul.f32 %v2408_v37, %v2272_v48 }
 0x103   : > { %1760 = vmatmul.mubr.msk.f32.vlgmr.msra.gmra.mxu0 %vm927_vm0, %v890_v26  ;;  %v2465_v46 = vpop.permute.xlu0 %514 }
 0x104   : > { %1783 = vmatprep.mubr.msk.f32.mxu1 %vm927_vm0, %v905_v41 }
 0x105   : > { %v571_v60 = vpop.permute.xlu1 %570 }
 0x106   : > { %1854 = vset.pattern.permute.xlu1 %v3209_v13 }
 0x107   : > { %350 = vperm.xlu1 %1854, %v2153_v21   ;;  %v2470_v23 = vpop.permute.xlu0 %582 }
 0x109   : > { %v2472_v57 = vpop.permute.xlu1 %574 }
 0x10a   : > { %v648_v48 = vmul.f32 %v2422_v25, %v2472_v57  ;;  %v436_v57 = vmul.f32 %v2417_v16, %v2370_v3 }
 0x10b   : > { %1855 = vset.pattern.permute.xlu1 %v3210_v12  ;;  %v2475_v51 = vpop.permute.xlu0 %522 }
 0x10c   : > { %734 = vperm.xlu1 %1855, %v2145_v19  }
 0x10e   : > { %v383_v18 = vpop.permute.xlu1 %382 }
 0x10f   : > { %v2478_v6 = vpop.permute.xlu0 %590 }
 0x110   : > { %798 = vperm.xlu1 %1855, %v2206_v35   ;;  %v265_v35 = vmul.f32 %v2408_v37, %v2352_v29  ;;  %v283_v29 = vadd.f32 %v2045_v1, %v251_v53 }
 0x112   : > { %v297_v32 = vadd.f32 %v2045_v1, %v265_v35 }
 0x113   : > { %v767_v33 = vpop.permute.xlu1 %766  ;;  %v2481_v42 = vpop.permute.xlu0 %530 }
 0x114   : > { %1856 = vset.pattern.permute.xlu1 %v3209_v13 }
 0x115   : > { %418 = vperm.xlu1 %1856, %v2211_v36  }
 0x117   : > { %v2485_v28 = vpop.permute.xlu0 %598 }
 0x118   : > { %3216 = vst [vmem:[#allocation28_spill] sm:$0xff] %v2485_v28  ;;  %v2487_v31 = vpop.permute.xlu1 %386 }
 0x119   : > { %1857 = vset.pattern.permute.xlu1 %v3210_v12 }
 0x11a   : > { %802 = vperm.xlu1 %1857, %v2203_v34   ;;  %v461_v34 = vmul.f32 %v2417_v16, %v2425_v44 }
 0x11b   : > { %v2491_v19 = vpop.permute.xlu0 %538 }
 0x11c   : > { %3217 = vst [vmem:[#allocation29_spill] sm:$0xff] %v2491_v19  ;;  %v493_v41 = vadd.f32 %v461_v34, %v297_v32  ;;  %v447_v19 = vmul.f32 %v2417_v16, %v2443_v27  ;;  %v254_v27 = vmul.f32 %v2408_v37, %v2310_v59  ;;  %v256_v34 = vmul.f32 %v2408_v37, %v2316_v61 }
 0x11d   : > { %v771_v24 = vpop.permute.xlu1 %770  ;;  %v257_v61 = vmul.f32 %v2408_v37, %v2325_v7 }
 0x11e   : > { %1858 = vset.pattern.permute.xlu1 %v3206_v8  ;;  %v479_v53 = vadd.f32 %v447_v19, %v283_v29  ;;  %v452_v29 = vmul.f32 %v2417_v16, %v2414_v10  ;;  %v288_v7 = vadd.f32 %v2045_v1, %v256_v34  ;;  %v453_v10 = vmul.f32 %v2417_v16, %v383_v18 }
 0x11f   : > { %546 = vperm.xlu1 %1858, %v2153_v21   ;;  %v2497_v40 = vpop.permute.xlu0 %606 }
 0x120   : > { %3218 = vst [vmem:[#allocation30_spill] sm:$0xff] %v2497_v40 }
 0x122   : > { %v579_v54 = vpop.permute.xlu1 %578 }
 0x123   : > { %550 = vperm.xlu1 %1858, %v2150_v20   ;;  %v611_v26 = vpop.permute.xlu0 %610  ;;  %v239_v20 = vmul.f32 %v2408_v37, %v2258_v43  ;;  %v649_v34 = vmul.f32 %v2422_v25, %v579_v54 }
 0x124   : > { %v657_v40 = vmul.f32 %v2422_v25, %v611_v26 }
 0x125   : > { %v271_v59 = vadd.f32 %v2045_v1, %v239_v20  ;;  %v646_v20 = vmul.f32 %v2422_v25, %v2428_v17  ;;  %v484_v17 = vadd.f32 %v452_v29, %v288_v7 }
 0x126   : > { %v2511_v28 = vadd.f32 %v657_v40, %v493_v41  ;;  %v2513_v35 = vpop.permute.xlu1 %518  ;;  %v451_v40 = vmul.f32 %v2417_v16, %v2405_v30  ;;  %v450_v41 = vmul.f32 %v2417_v16, %v2401_v56  ;;  %v647_v30 = vmul.f32 %v2422_v25, %v571_v60 }
 0x127   : > { %614 = vperm.xlu1 %1858, %v2211_v36   ;;  %v555_v44 = vpop.permute.xlu0 %554  ;;  %v240_v56 = vmul.f32 %v2408_v37, %v2264_v45  ;;  %v843_v60 = vmul.f32 %v2432_v9, %v767_v33  ;;  %v435_v45 = vmul.f32 %v2417_v16, %v2368_v2  ;;  %v844_v2 = vmul.f32 %v2432_v9, %v771_v24 }
 0x128   : > { %v643_v32 = vmul.f32 %v2422_v25, %v555_v44  ;;  %v286_v44 = vadd.f32 %v2045_v1, %v254_v27  ;;  %v289_v27 = vadd.f32 %v2045_v1, %v257_v61 }
 0x129   : > { %v467_v29 = vadd.f32 %v435_v45, %v271_v59  ;;  %v650_v45 = vmul.f32 %v2422_v25, %v2470_v23  ;;  %v243_v23 = vmul.f32 %v2408_v37, %v2279_v50 }
 0x12a   : > { %v2526_v26 = vadd.f32 %v643_v32, %v479_v53  ;;  %v483_v53 = vadd.f32 %v451_v40, %v287_v62  ;;  %v258_v32 = vmul.f32 %v2408_v37, %v2323_v63  ;;  %v631_v63 = vmul.f32 %v2422_v25, %v2461_v55 }
 0x12b   : > { %1860 = vset.pattern.permute.xlu1 %v3209_v13  ;;  %v2531_v43 = vpop.permute.xlu1 %390  ;;  %v2533_v19 = vpop.permute.xlu0 %622  ;;  %v272_v55 = vadd.f32 %v2045_v1, %v240_v56  ;;  %v437_v56 = vmul.f32 %v2417_v16, %v2374_v4 }
 0x12c   : > { %3219 = vst [vmem:[#allocation31_spill] sm:$0xff] %v2526_v26  ;;  %3220 = vst [vmem:[#allocation32_spill] sm:$0xff] %v2533_v19  ;;  %422 = vperm.xlu1 %1860, %v2222_v39   ;;  %v482_v26 = vadd.f32 %v450_v41, %v286_v44  ;;  %v679_v19 = vadd.f32 %v647_v30, %v483_v53  ;;  %v485_v41 = vadd.f32 %v453_v10, %v289_v27 }
 0x12d   : > { %v680_v30 = vadd.f32 %v648_v48, %v484_v17  ;;  %v290_v24 = vadd.f32 %v2045_v1, %v258_v32  ;;  %v663_v3 = vadd.f32 %v631_v63, %v467_v29  ;;  %v438_v63 = vmul.f32 %v2417_v16, %v2377_v15 }
 0x12e   : > { %v678_v62 = vadd.f32 %v646_v20, %v482_v26  ;;  %v875_v61 = vadd.f32 %v843_v60, %v679_v19  ;;  %v454_v26 = vmul.f32 %v2417_v16, %v2487_v31  ;;  %v681_v20 = vadd.f32 %v649_v34, %v485_v41 }
 0x12f   : > { %v876_v53 = vadd.f32 %v844_v2, %v680_v30  ;;  %v273_v31 = vadd.f32 %v2045_v1, %v241_v58  ;;  %v633_v58 = vmul.f32 %v2422_v25, %v2465_v46  ;;  %v634_v15 = vmul.f32 %v2422_v25, %v2513_v35 }
 0x130   : > { %1861 = vset.pattern.permute.xlu1 %v3210_v12  ;;  %v775_v18 = vpop.permute.xlu1 %774  ;;  %v763_v33 = vpop.permute.xlu0 %762  ;;  %v907_v60 = vmax.f32 %v875_v61, 0.0  ;;  %v486_v48 = vadd.f32 %v454_v26, %v290_v24  ;;  %v275_v26 = vadd.f32 %v2045_v1, %v243_v23  ;;  %v244_v35 = vmul.f32 %v2408_v37, %v2277_v49 }
 0x131   : > { %v842_v40 = vmul.f32 %v2432_v9, %v763_v33  ;;  %742 = vperm.xlu1 %1861, %v2153_v21   ;;  %v845_v54 = vmul.f32 %v2432_v9, %v775_v18  ;;  %v632_v21 = vmul.f32 %v2422_v25, %v2459_v0  ;;  %v468_v0 = vadd.f32 %v436_v57, %v272_v55 }
 0x132   : > { %v908_v34 = vmax.f32 %v876_v53, 0.0  ;;  %v439_v55 = vmul.f32 %v2417_v16, %v2380_v5  ;;  %v245_v5 = vmul.f32 %v2408_v37, %v2286_v52 }
 0x133   : > { %v874_v44 = vadd.f32 %v842_v40, %v678_v62  ;;  %v877_v32 = vadd.f32 %v845_v54, %v681_v20  ;;  %v664_v17 = vadd.f32 %v632_v21, %v468_v0  ;;  %v469_v62 = vadd.f32 %v437_v56, %v273_v31 }
 0x134   : > { %v703_v7 = vpop.permute.xlu0 %702  ;;  %v682_v40 = vadd.f32 %v650_v45, %v486_v48  ;;  %v440_v31 = vmul.f32 %v2417_v16, %v2383_v14  ;;  %v259_v14 = vmul.f32 %v2408_v37, %v2333_v11  ;;  %v277_v48 = vadd.f32 %v2045_v1, %v245_v5  ;;  %v3225_v5 = vld [vmem:[#allocation24_spill] sm:$0xff] }
 0x135   : > { %v906_v19 = vmax.f32 %v874_v44, 0.0  ;;  %v827_v10 = vmul.f32 %v2432_v9, %v703_v7  ;;  %1862 = vset.pattern.permute.xlu1 %v3209_v13  ;;  %v2577_v59 = vpop.permute.xlu1 %394  ;;  %v242_v13 = vmul.f32 %v2408_v37, %v2270_v47  ;;  %v909_v2 = vmax.f32 %v877_v32, 0.0 }
 0x136   : > { %362 = vperm.xlu1 %1862, %v2158_v22   ;;  %v665_v61 = vadd.f32 %v633_v58, %v469_v62  ;;  %v291_v23 = vadd.f32 %v2045_v1, %v259_v14 }
 0x137   : > { %v859_v27 = vadd.f32 %v827_v10, %v663_v3  ;;  %1784 = vmatmul.mubr.msk.f32.vlgmr.msra.gmra.mxu1 %vm927_vm0, %v906_v19  ;;  %v274_v41 = vadd.f32 %v2045_v1, %v242_v13  ;;  %v635_v3 = vmul.f32 %v2422_v25, %v2475_v51  ;;  %v276_v51 = vadd.f32 %v2045_v1, %v244_v35 }
 0x138   : > { %1786 = vmatprep.mubr.msk.f32.mxu1 %vm927_vm0, %v907_v60  ;;  %v707_v4 = vpop.permute.xlu0 %706 }
 0x139   : > { %v891_v18 = vmax.f32 %v859_v27, 0.0  ;;  %v828_v33 = vmul.f32 %v2432_v9, %v707_v4  ;;  %v470_v44 = vadd.f32 %v438_v63, %v274_v41  ;;  %v3221_v27 = vld [vmem:[#allocation23_spill] sm:$0xff] }
 0x13a   : > { %426 = vperm.xlu1 %1862, %v2219_v38   ;;  %v779_v47 = vpop.permute.xlu1 %778  ;;  %v441_v13 = vmul.f32 %v2417_v16, %v3221_v27 }
 0x13b   : > { %v860_v46 = vadd.f32 %v828_v33, %v664_v17  ;;  %v846_v57 = vmul.f32 %v2432_v9, %v779_v47  ;;  %1762 = vmatprep.mubr.msk.f32.mxu0 %vm927_vm0, %v891_v18  ;;  %1787 = vmatmul.mubr.msk.f32.gmra.mxu1 %vm927_vm0, %v908_v34  ;;  %v666_v53 = vadd.f32 %v634_v15, %v470_v44 }
 0x13c   : > { %1789 = vmatprep.mubr.msk.f32.mxu1 %vm927_vm0, %v909_v2  ;;  %v711_v50 = vpop.permute.xlu0 %710  ;;  %v637_v34 = vmul.f32 %v2422_v25, %v2481_v42  ;;  %v473_v63 = vadd.f32 %v441_v13, %v277_v48 }
 0x13d   : > { %v892_v54 = vmax.f32 %v860_v46, 0.0  ;;  %v878_v29 = vadd.f32 %v846_v57, %v682_v40  ;;  %v829_v30 = vmul.f32 %v2432_v9, %v711_v50  ;;  %v3222_v57 = vld [vmem:[#allocation8_spill] sm:$0xff] }
 0x13e   : > { %1863 = vset.pattern.permute.xlu1 %v3210_v12  ;;  %v669_v46 = vadd.f32 %v637_v34, %v473_v63  ;;  %v3228_v63 = vld [vmem:[#allocation28_spill] sm:$0xff] }
 0x13f   : > { %v910_v24 = vmax.f32 %v878_v29, 0.0  ;;  %v861_v21 = vadd.f32 %v829_v30, %v665_v61  ;;  %810 = vperm.xlu1 %1863, %v2211_v36   ;;  %v587_v20 = vpop.permute.xlu1 %586  ;;  %1763 = vmatmul.mubr.msk.f32.gmra.mxu0 %vm927_vm0, %v892_v54  ;;  %v471_v36 = vadd.f32 %v439_v55, %v275_v26  ;;  %v3223_v61 = vld [vmem:[#allocation15_spill] sm:$0xff] }
 0x140   : > { %v715_v7 = vpop.permute.xlu0 %714  ;;  %v651_v62 = vmul.f32 %v2422_v25, %v587_v20  ;;  %v260_v50 = vmul.f32 %v2408_v37, %v3223_v61  ;;  %v3229_v61 = vld [vmem:[#allocation10_spill] sm:$0xff] }
 0x141   : > { %v893_v19 = vmax.f32 %v861_v21, 0.0  ;;  %v830_v10 = vmul.f32 %v2432_v9, %v715_v7  ;;  %1790 = vmatmul.mubr.msk.f32.gmra.mxu1 %vm927_vm0, %v910_v24  ;;  %v667_v32 = vadd.f32 %v635_v3, %v471_v36  ;;  %v652_v21 = vmul.f32 %v2422_v25, %v2478_v6 }
 0x142   : > { %v292_v44 = vadd.f32 %v2045_v1, %v260_v50  ;;  %v442_v36 = vmul.f32 %v2417_v16, %v3225_v5  ;;  %v248_v50 = vmul.f32 %v2408_v37, %v3229_v61 }
 0x143   : > { %v862_v56 = vadd.f32 %v830_v10, %v666_v53  ;;  %1864 = vset.pattern.permute.xlu1 %v3206_v8  ;;  %v527_v49 = vpop.permute.xlu1 %526  ;;  %1765 = vmatprep.mubr.msk.f32.mxu0 %vm927_vm0, %v893_v19  ;;  %v472_v8 = vadd.f32 %v440_v31, %v276_v51 }
 0x144   : > { %618 = vperm.xlu1 %1864, %v2222_v39   ;;  %v719_v60 = vpop.permute.xlu0 %718  ;;  %v636_v45 = vmul.f32 %v2422_v25, %v527_v49  ;;  %v455_v39 = vmul.f32 %v2417_v16, %v2531_v43 }
 0x145   : > { %v894_v0 = vmax.f32 %v862_v56, 0.0  ;;  %v831_v52 = vmul.f32 %v2432_v9, %v719_v60  ;;  %v3226_v60 = vld [vmem:[#allocation17_spill] sm:$0xff] }
 0x146   : > { %v668_v11 = vadd.f32 %v636_v45, %v472_v8  ;;  %v487_v43 = vadd.f32 %v455_v39, %v291_v23  ;;  %v3227_v39 = vld [vmem:[#allocation16_spill] sm:$0xff] }
 0x147   : > { %v863_v58 = vadd.f32 %v831_v52, %v667_v32  ;;  %1766 = vmatmul.mubr.msk.f32.gmra.mxu0 %vm927_vm0, %v894_v0  ;;  %v261_v32 = vmul.f32 %v2408_v37, %v3226_v60 }
 0x148   : > { %558 = vperm.xlu1 %1864, %v2158_v22   ;;  %v399_v4 = vpop.permute.xlu1 %398  ;;  %v723_v17 = vpop.permute.xlu0 %722  ;;  %v683_v15 = vadd.f32 %v651_v62, %v487_v43 }
 0x149   : > { %v895_v18 = vmax.f32 %v863_v58, 0.0  ;;  %v832_v33 = vmul.f32 %v2432_v9, %v723_v17  ;;  %v457_v45 = vmul.f32 %v2417_v16, %v399_v4  ;;  %v293_v48 = vadd.f32 %v2045_v1, %v261_v32 }
 0x14a   : > { %v262_v17 = vmul.f32 %v2408_v37, %v3227_v39 }
 0x14b   : > { %v864_v2 = vadd.f32 %v832_v33, %v668_v11  ;;  %1768 = vmatprep.mubr.msk.f32.mxu0 %vm927_vm0, %v895_v18  ;;  %v489_v13 = vadd.f32 %v457_v45, %v293_v48  ;;  %v3235_v45 = vld [vmem:[#allocation18_spill] sm:$0xff] }
 0x14c   : > { %1866 = vset.pattern.permute.xlu1 %v3210_v12  ;;  %v727_v47 = vpop.permute.xlu0 %726  ;;  %v456_v12 = vmul.f32 %v2417_v16, %v2577_v59  ;;  %v294_v33 = vadd.f32 %v2045_v1, %v262_v17 }
 0x14d   : > { %v896_v40 = vmax.f32 %v864_v2, 0.0  ;;  %v833_v42 = vmul.f32 %v2432_v9, %v727_v47  ;;  %750 = vperm.xlu1 %1866, %v3222_v57   ;;  %v783_v41 = vpop.permute.xlu1 %782  ;;  %v654_v2 = vmul.f32 %v2422_v25, %v3228_v63 }
 0x14e   : > { %v847_v54 = vmul.f32 %v2432_v9, %v783_v41  ;;  %v488_v20 = vadd.f32 %v456_v12, %v292_v44  ;;  %v3231_v12 = vld [vmem:[#allocation26_spill] sm:$0xff] }
 0x14f   : > { %v865_v29 = vadd.f32 %v833_v42, %v669_v46  ;;  %1769 = vmatmul.mubr.msk.f32.gmra.mxu0 %vm927_vm0, %v896_v40 }
 0x150   : > { %v879_v30 = vadd.f32 %v847_v54, %v683_v15  ;;  %v684_v59 = vadd.f32 %v652_v21, %v488_v20  ;;  %v731_v31 = vpop.permute.xlu0 %730  ;;  %v3230_v54 = vld [vmem:[#allocation11_spill] sm:$0xff] }
 0x151   : > { %v897_v26 = vmax.f32 %v865_v29, 0.0  ;;  %754 = vperm.xlu1 %1866, %v2158_v22   ;;  %v3224_v22 = vld [vmem:[#allocation9_spill] sm:$0xff]  ;;  %v834_v49 = vmul.f32 %v2432_v9, %v731_v31  ;;  %v247_v29 = vmul.f32 %v2408_v37, %v3230_v54 }
 0x152   : > { %v911_v55 = vmax.f32 %v879_v30, 0.0  ;;  %v403_v24 = vpop.permute.xlu1 %402  ;;  %v246_v53 = vmul.f32 %v2408_v37, %v3224_v22  ;;  %v444_v30 = vmul.f32 %v2417_v16, %v3231_v12 }
 0x153   : > { %1771 = vmatprep.mubr.msk.f32.mxu0 %vm927_vm0, %v897_v26  ;;  %v458_v18 = vmul.f32 %v2417_v16, %v403_v24  ;;  %v280_v26 = vadd.f32 %v2045_v1, %v248_v50  ;;  %v3232_v24 = vld [vmem:[#allocation25_spill] sm:$0xff] }
 0x154   : > { %1792 = vmatprep.mubr.msk.f32.mxu1 %vm927_vm0, %v911_v55  ;;  %v278_v6 = vadd.f32 %v2045_v1, %v246_v53  ;;  %v279_v55 = vadd.f32 %v2045_v1, %v247_v29  ;;  %v443_v21 = vmul.f32 %v2417_v16, %v3232_v24  ;;  %v739_v53 = vpop.permute.xlu0 %738  ;;  %v3239_v29 = vld [vmem:[#allocation13_spill] sm:$0xff] }
 0x155   : > { %818 = vperm.xlu1 %1866, %v2219_v38   ;;  %v490_v43 = vadd.f32 %v458_v18, %v294_v33  ;;  %v3236_v33 = vld [vmem:[#allocation30_spill] sm:$0xff]  ;;  %v249_v12 = vmul.f32 %v2408_v37, %v3239_v29 }
 0x156   : > { %v474_v38 = vadd.f32 %v442_v36, %v278_v6  ;;  %v475_v5 = vadd.f32 %v443_v21, %v279_v55 }
 0x157   : > { %v787_v35 = vpop.permute.xlu1 %786  ;;  %v686_v46 = vadd.f32 %v654_v2, %v490_v43  ;;  %v281_v24 = vadd.f32 %v2045_v1, %v249_v12 }
 0x158   : > { %v848_v7 = vmul.f32 %v2432_v9, %v787_v35  ;;  %v476_v35 = vadd.f32 %v444_v30, %v280_v26  ;;  %v807_v17 = vpop.permute.xlu0 %806 }
 0x15a   : > { %v880_v3 = vadd.f32 %v848_v7, %v684_v59  ;;  %v3233_v59 = vld [vmem:[#allocation19_spill] sm:$0xff] }
 0x15b   : > { %v263_v7 = vmul.f32 %v2408_v37, %v3233_v59 }
 0x15c   : > { %v912_v19 = vmax.f32 %v880_v3, 0.0  ;;  %v595_v10 = vpop.permute.xlu1 %594  ;;  %v3234_v3 = vld [vmem:[#allocation29_spill] sm:$0xff] }
 0x15d   : > { %v653_v8 = vmul.f32 %v2422_v25, %v595_v10  ;;  %v639_v22 = vmul.f32 %v2422_v25, %v3234_v3  ;;  %v295_v31 = vadd.f32 %v2045_v1, %v263_v7  ;;  %v747_v7 = vpop.permute.xlu0 %746 }
 0x15e   : > { %1793 = vmatmul.mubr.msk.f32.gmra.mxu1 %vm927_vm0, %v912_v19  ;;  %v836_v19 = vmul.f32 %v2432_v9, %v739_v53  ;;  %v838_v3 = vmul.f32 %v2432_v9, %v747_v7 }
 0x15f   : > { %v685_v34 = vadd.f32 %v653_v8, %v489_v13 }
 0x160   : > { %v535_v56 = vpop.permute.xlu1 %534 }
 0x161   : > { %v638_v51 = vmul.f32 %v2422_v25, %v535_v56  ;;  %v671_v56 = vadd.f32 %v639_v22, %v475_v5 }
 0x163   : > { %v670_v0 = vadd.f32 %v638_v51, %v474_v38 }
 0x165   : > { %v866_v52 = vadd.f32 %v834_v49, %v670_v0  ;;  %v407_v14 = vpop.permute.xlu1 %406 }
 0x166   : > { %v459_v36 = vmul.f32 %v2417_v16, %v407_v14 }
 0x167   : > { %v898_v27 = vmax.f32 %v866_v52, 0.0  ;;  %v264_v52 = vmul.f32 %v2408_v37, %v3235_v45 }
 0x168   : > { %v491_v60 = vadd.f32 %v459_v36, %v295_v31 }
 0x169   : > { %1772 = vmatmul.mubr.msk.f32.gmra.mxu0 %vm927_vm0, %v898_v27  ;;  %v296_v39 = vadd.f32 %v2045_v1, %v264_v52 }
 0x16a   : > { %v791_v58 = vpop.permute.xlu1 %790 }
 0x16b   : > { %v849_v11 = vmul.f32 %v2432_v9, %v791_v58 }
 0x16d   : > { %v881_v4 = vadd.f32 %v849_v11, %v685_v34 }
 0x16f   : > { %v913_v23 = vmax.f32 %v881_v4, 0.0  ;;  %v411_v62 = vpop.permute.xlu1 %410  ;;  %v853_v4 = vmul.f32 %v2432_v9, %v807_v17 }
 0x170   : > { %v460_v13 = vmul.f32 %v2417_v16, %v411_v62 }
 0x171   : > { %1795 = vmatprep.mubr.msk.f32.mxu1 %vm927_vm0, %v913_v23  ;;  %v656_v23 = vmul.f32 %v2422_v25, %v3236_v33  ;;  %v885_v43 = vadd.f32 %v853_v4, %v2511_v28 }
 0x172   : > { %v492_v18 = vadd.f32 %v460_v13, %v296_v39  ;;  %v3243_v13 = vld [vmem:[#allocation22_spill] sm:$0xff] }
 0x174   : > { %v795_v47 = vpop.permute.xlu1 %794  ;;  %v688_v62 = vadd.f32 %v656_v23, %v492_v18  ;;  %v815_v23 = vpop.permute.xlu0 %814 }
 0x175   : > { %v850_v40 = vmul.f32 %v2432_v9, %v795_v47 }
 0x177   : > { %v882_v42 = vadd.f32 %v850_v40, %v686_v46 }
 0x179   : > { %v914_v57 = vmax.f32 %v882_v42, 0.0  ;;  %v603_v41 = vpop.permute.xlu1 %602  ;;  %v917_v42 = vmax.f32 %v885_v43, 0.0 }
 0x17a   : > { %v655_v38 = vmul.f32 %v2422_v25, %v603_v41  ;;  %v3237_v41 = vld [vmem:[#allocation12_spill] sm:$0xff] }
 0x17b   : > { %1796 = vmatmul.mubr.msk.f32.gmra.mxu1 %vm927_vm0, %v914_v57  ;;  %v250_v61 = vmul.f32 %v2408_v37, %v3237_v41  ;;  %v3244_v41 = vld [vmem:[#allocation7_spill] sm:$0xff] }
 0x17c   : > { %v687_v48 = vadd.f32 %v655_v38, %v491_v60  ;;  %v3241_v38 = vld [vmem:[#allocation20_spill] sm:$0xff] }
 0x17d   : > { %v543_v15 = vpop.permute.xlu1 %542  ;;  %v282_v28 = vadd.f32 %v2045_v1, %v250_v61 }
 0x17e   : > { %v640_v44 = vmul.f32 %v2422_v25, %v543_v15  ;;  %v3238_v15 = vld [vmem:[#allocation27_spill] sm:$0xff] }
 0x17f   : > { %v446_v54 = vmul.f32 %v2417_v16, %v3238_v15 }
 0x180   : > { %v672_v10 = vadd.f32 %v640_v44, %v476_v35 }
 0x181   : > { %v478_v55 = vadd.f32 %v446_v54, %v282_v28 }
 0x182   : > { %v351_v20 = vpop.permute.xlu1 %350  ;;  %v868_v51 = vadd.f32 %v836_v19, %v672_v10 }
 0x183   : > { %v445_v26 = vmul.f32 %v2417_v16, %v351_v20  ;;  %v3240_v20 = vld [vmem:[#allocation21_spill] sm:$0xff] }
 0x184   : > { %v900_v14 = vmax.f32 %v868_v51, 0.0  ;;  %v268_v31 = vmul.f32 %v2408_v37, %v3240_v20 }
 0x185   : > { %v477_v59 = vadd.f32 %v445_v26, %v281_v24 }
 0x187   : > { %v735_v6 = vpop.permute.xlu1 %734 }
 0x188   : > { %v835_v49 = vmul.f32 %v2432_v9, %v735_v6 }
 0x18a   : > { %v867_v32 = vadd.f32 %v835_v49, %v671_v56  ;;  %v266_v49 = vmul.f32 %v2408_v37, %v3241_v38 }
 0x18b   : > { %v799_v0 = vpop.permute.xlu1 %798 }
 0x18c   : > { %v899_v8 = vmax.f32 %v867_v32, 0.0  ;;  %v851_v27 = vmul.f32 %v2432_v9, %v799_v0  ;;  %v300_v32 = vadd.f32 %v2045_v1, %v268_v31  ;;  %v298_v45 = vadd.f32 %v2045_v1, %v266_v49 }
 0x18e   : > { %v883_v58 = vadd.f32 %v851_v27, %v687_v48  ;;  %1774 = vmatprep.mubr.msk.f32.mxu0 %vm927_vm0, %v899_v8  ;;  %v3242_v48 = vld [vmem:[#allocation32_spill] sm:$0xff] }
 0x18f   : > { %1775 = vmatmul.mubr.msk.f32.gmra.mxu0 %vm927_vm0, %v900_v14  ;;  %v660_v8 = vmul.f32 %v2422_v25, %v3242_v48 }
 0x190   : > { %v915_v34 = vmax.f32 %v883_v58, 0.0  ;;  %v419_v11 = vpop.permute.xlu1 %418  ;;  %v267_v58 = vmul.f32 %v2408_v37, %v3243_v13 }
 0x191   : > { %v462_v51 = vmul.f32 %v2417_v16, %v419_v11 }
 0x192   : > { %1798 = vmatprep.mubr.msk.f32.mxu1 %vm927_vm0, %v915_v34  ;;  %v299_v33 = vadd.f32 %v2045_v1, %v267_v58 }
 0x193   : > { %v494_v14 = vadd.f32 %v462_v51, %v298_v45 }
 0x195   : > { %v803_v63 = vpop.permute.xlu1 %802 }
 0x196   : > { %v852_v2 = vmul.f32 %v2432_v9, %v803_v63 }
 0x198   : > { %v884_v47 = vadd.f32 %v852_v2, %v688_v62 }
 0x19a   : > { %v916_v46 = vmax.f32 %v884_v47, 0.0  ;;  %v547_v40 = vpop.permute.xlu1 %546  ;;  %v855_v47 = vmul.f32 %v2432_v9, %v815_v23 }
 0x19b   : > { %v641_v21 = vmul.f32 %v2422_v25, %v547_v40 }
 0x19c   : > { %1799 = vmatmul.mubr.msk.f32.gmra.mxu1 %vm927_vm0, %v916_v46 }
 0x19d   : > { %1801 = vmatprep.mubr.msk.f32.mxu1 %vm927_vm0, %v917_v42  ;;  %v673_v53 = vadd.f32 %v641_v21, %v477_v59 }
 0x19e   : > { %v551_v57 = vpop.permute.xlu1 %550 }
 0x19f   : > { %v642_v30 = vmul.f32 %v2422_v25, %v551_v57 }
 0x1a1   : > { %v674_v35 = vadd.f32 %v642_v30, %v478_v55  ;;  %v3246_v55 = vld [vmem:[#allocation31_spill] sm:$0xff] }
 0x1a2   : > { %v615_v50 = vpop.permute.xlu1 %614 }
 0x1a3   : > { %v870_v10 = vadd.f32 %v838_v3, %v674_v35  ;;  %v658_v52 = vmul.f32 %v2422_v25, %v615_v50  ;;  %v3245_v50 = vld [vmem:[#allocation14_spill] sm:$0xff] }
 0x1a4   : > { %v252_v15 = vmul.f32 %v2408_v37, %v3245_v50 }
 0x1a5   : > { %v902_v56 = vmax.f32 %v870_v10, 0.0  ;;  %v690_v34 = vadd.f32 %v658_v52, %v494_v14 }
 0x1a6   : > { %v284_v28 = vadd.f32 %v2045_v1, %v252_v15 }
 0x1a7   : > { %v423_v44 = vpop.permute.xlu1 %422 }
 0x1a8   : > { %v463_v18 = vmul.f32 %v2417_v16, %v423_v44 }
 0x1aa   : > { %v495_v2 = vadd.f32 %v463_v18, %v299_v33 }
 0x1ac   : > { %v743_v22 = vpop.permute.xlu1 %742 }
 0x1ad   : > { %v837_v19 = vmul.f32 %v2432_v9, %v743_v22 }
 0x1af   : > { %v869_v5 = vadd.f32 %v837_v19, %v673_v53 }
 0x1b1   : > { %v901_v36 = vmax.f32 %v869_v5, 0.0  ;;  %v363_v6 = vpop.permute.xlu1 %362 }
 0x1b2   : > { %v448_v29 = vmul.f32 %v2417_v16, %v363_v6 }
 0x1b3   : > { %1777 = vmatprep.mubr.msk.f32.mxu0 %vm927_vm0, %v901_v36 }
 0x1b4   : > { %1778 = vmatmul.mubr.msk.f32.gmra.mxu0 %vm927_vm0, %v902_v56  ;;  %v480_v44 = vadd.f32 %v448_v29, %v284_v28 }
 0x1b5   : > { %v427_v60 = vpop.permute.xlu1 %426 }
 0x1b6   : > { %v464_v0 = vmul.f32 %v2417_v16, %v427_v60 }
 0x1b8   : > { %v496_v27 = vadd.f32 %v464_v0, %v300_v32 }
 0x1ba   : > { %v811_v39 = vpop.permute.xlu1 %810  ;;  %v692_v17 = vadd.f32 %v660_v8, %v496_v27 }
 0x1bb   : > { %v854_v11 = vmul.f32 %v2432_v9, %v811_v39 }
 0x1bd   : > { %v886_v4 = vadd.f32 %v854_v11, %v690_v34 }
 0x1bf   : > { %v918_v63 = vmax.f32 %v886_v4, 0.0  ;;  %v619_v62 = vpop.permute.xlu1 %618 }
 0x1c0   : > { %v659_v43 = vmul.f32 %v2422_v25, %v619_v62 }
 0x1c1   : > { %1802 = vmatmul.mubr.msk.f32.gmra.mxu1 %vm927_vm0, %v918_v63 }
 0x1c2   : > { %v691_v46 = vadd.f32 %v659_v43, %v495_v2 }
 0x1c3   : > { %v559_v40 = vpop.permute.xlu1 %558  ;;  %v1761_v42 = vpop.f32.mrf.mxu0 }
 0x1c4   : > { %v887_v57 = vadd.f32 %v855_v47, %v691_v46  ;;  %v2753_v61 = vadd.f32 %v1761_v42, %v3244_v41  ;;  %v644_v30 = vmul.f32 %v2422_v25, %v559_v40 }
 0x1c5   : > { %v1090_v5 = vpop.f32.mrf.mxu0 }
 0x1c6   : > { %v919_v54 = vmax.f32 %v887_v57, 0.0  ;;  %1251 = vmax.xlane.f32.xlu1 %v2753_v61  ;;  %v676_v35 = vadd.f32 %v644_v30, %v480_v44 }
 0x1c8   : > { %v751_v12 = vpop.permute.xlu1 %750  ;;  %1804 = vmatprep.mubr.msk.f32.mxu1 %vm927_vm0, %v919_v54 }
 0x1c9   : > { %v839_v26 = vmul.f32 %v2432_v9, %v751_v12 }
 0x1cb   : > { %v871_v24 = vadd.f32 %v839_v26, %v3246_v55 }
 0x1cc   : > { %v755_v21 = vpop.permute.xlu1 %754 }
 0x1cd   : > { %v903_v37 = vmax.f32 %v871_v24, 0.0  ;;  %v840_v59 = vmul.f32 %v2432_v9, %v755_v21 }
 0x1cf   : > { %v872_v7 = vadd.f32 %v840_v59, %v676_v35  ;;  %1780 = vmatprep.mubr.msk.f32.mxu0 %vm927_vm0, %v903_v37 }
 0x1d0   : > { %v819_v16 = vpop.permute.xlu1 %818 }
 0x1d1   : > { %v904_v3 = vmax.f32 %v872_v7, 0.0  ;;  %v856_v22 = vmul.f32 %v2432_v9, %v819_v16  ;;  %v2777_v9 = vadd.f32 %v3244_v41, %v1090_v5 }
 0x1d3   : > { %v888_v53 = vadd.f32 %v856_v22, %v692_v17  ;;  %1781 = vmatmul.mubr.msk.f32.gmra.mxu0 %vm927_vm0, %v904_v3 }
 0x1d5   : > { %v920_v25 = vmax.f32 %v888_v53, 0.0 }
 0x1d7   : > { %1805 = vmatmul.mubr.msk.f32.gmra.mxu1 %vm927_vm0, %v920_v25 }
 0x1f7   : > { %v1785_v19 = vpop.f32.mrf.mxu1 }
 0x1f8   : > { %v2770_v10 = vadd.f32 %v1785_v19, %v3244_v41 }
 0x1f9   : > { %v1170_v36 = vpop.f32.mrf.mxu1 }
 0x1fa   : > { %v2773_v6 = vadd.f32 %v3244_v41, %v1170_v36  ;;  %1283 = vmax.xlane.f32.xlu0 %v2770_v10 }
 0x1fb   : > { %v1788_v20 = vpop.f32.mrf.mxu1 }
 0x1fc   : > { %1281 = vmax.xlane.f32.xlu1 %v2773_v6  ;;  %v2790_v51 = vadd.f32 %v1788_v20, %v3244_v41 }
 0x1fd   : > { %v1180_v31 = vpop.f32.mrf.mxu1 }
 0x1fe   : > { %v2781_v56 = vadd.f32 %v3244_v41, %v1180_v31  ;;  %1249 = vmax.xlane.f32.xlu0 %v2777_v9 }
 0x1ff   : > { %v1764_v38 = vpop.f32.mrf.mxu0 }
 0x200   : > { %v2785_v49 = vadd.f32 %v1764_v38, %v3244_v41  ;;  %1285 = vmax.xlane.f32.xlu1 %v2781_v56 }
 0x201   : > { %v1100_v60 = vpop.f32.mrf.mxu0  ;;  %v1791_v32 = vpop.f32.mrf.mxu1 }
 0x202   : > { %1255 = vmax.xlane.f32.xlu0 %v2785_v49  ;;  %v2794_v45 = vadd.f32 %v3244_v41, %v1100_v60  ;;  %v2849_v24 = vadd.f32 %v1791_v32, %v3244_v41 }
 0x203   : > { %v1190_v8 = vpop.f32.mrf.mxu1 }
 0x204   : > { %v2805_v14 = vadd.f32 %v3244_v41, %v1190_v8 }
 0x206   : > { %1287 = vmax.xlane.f32.xlu0 %v2790_v51 }
 0x207   : > { %v1767_v0 = vpop.f32.mrf.mxu0 }
 0x208   : > { %v2801_v27 = vadd.f32 %v1767_v0, %v3244_v41 }
 0x209   : > { %v1110_v52 = vpop.f32.mrf.mxu0 }
 0x20a   : > { %v2797_v48 = vadd.f32 %v3244_v41, %v1110_v52  ;;  %1253 = vmax.xlane.f32.xlu0 %v2794_v45 }
 0x20c   : > { %1257 = vmax.xlane.f32.xlu1 %v2797_v48 }
 0x20e   : > { %1259 = vmax.xlane.f32.xlu0 %v2801_v27 }
 0x20f   : > { %v1770_v13 = vpop.f32.mrf.mxu0 }
 0x210   : > { %v2809_v58 = vadd.f32 %v1770_v13, %v3244_v41  ;;  %1289 = vmax.xlane.f32.xlu1 %v2805_v14 }
 0x211   : > { %v1120_v39 = vpop.f32.mrf.mxu0 }
 0x212   : > { %v2813_v17 = vadd.f32 %v3244_v41, %v1120_v39  ;;  %1263 = vmax.xlane.f32.xlu0 %v2809_v58 }
 0x214   : > { %1261 = vmax.xlane.f32.xlu1 %v2813_v17 }
 0x21e   : > { %v1794_v42 = vpop.f32.mrf.mxu1 }
 0x21f   : > { %v2858_v16 = vadd.f32 %v1794_v42, %v3244_v41 }
 0x220   : > { %v1200_v50 = vpop.f32.mrf.mxu1 }
 0x221   : > { %v2853_v37 = vadd.f32 %v3244_v41, %v1200_v50 }
 0x229   : > { %v1773_v34 = vpop.f32.mrf.mxu0 }
 0x22a   : > { %v2818_v11 = vadd.f32 %v1773_v34, %v3244_v41 }
 0x22b   : > { %v1130_v18 = vpop.f32.mrf.mxu0 }
 0x22c   : > { %v2821_v4 = vadd.f32 %v3244_v41, %v1130_v18  ;;  %1267 = vmax.xlane.f32.xlu0 %v2818_v11 }
 0x22e   : > { %1265 = vmax.xlane.f32.xlu1 %v2821_v4 }
 0x23b   : > { %v1797_v15 = vpop.f32.mrf.mxu1 }
 0x23c   : > { %v2868_v20 = vadd.f32 %v1797_v15, %v3244_v41 }
 0x23d   : > { %v1210_v12 = vpop.f32.mrf.mxu1 }
 0x23e   : > { %v2863_v53 = vadd.f32 %v3244_v41, %v1210_v12 }
 0x24f   : > { %v1776_v33 = vpop.f32.mrf.mxu0  ;;  %v1252_v30 = vpop.xlane.xlu1 %1251 }
 0x250   : > { %v2826_v23 = vadd.f32 %v1776_v33, %v3244_v41  ;;  %v1314_v3 = vsub.f32 %v2753_v61, %v1252_v30 }
 0x251   : > { %v1140_v63 = vpop.f32.mrf.mxu0 }
 0x252   : > { %v2829_v62 = vadd.f32 %v3244_v41, %v1140_v63  ;;  %1271 = vmax.xlane.f32.xlu0 %v2826_v23 }
 0x254   : > { %1269 = vmax.xlane.f32.xlu1 %v2829_v62 }
 0x25c   : > { %v1800_v55 = vpop.f32.mrf.mxu1 }
 0x25d   : > { %v2878_v52 = vadd.f32 %v1800_v55, %v3244_v41 }
 0x25e   : > { %v1220_v7 = vpop.f32.mrf.mxu1 }
 0x25f   : > { %v2873_v38 = vadd.f32 %v3244_v41, %v1220_v7 }
 0x274   : > { %v1779_v2 = vpop.f32.mrf.mxu0 }
 0x275   : > { %v2834_v43 = vadd.f32 %v1779_v2, %v3244_v41 }
 0x276   : > { %v1150_v47 = vpop.f32.mrf.mxu0 }
 0x277   : > { %v2837_v46 = vadd.f32 %v3244_v41, %v1150_v47  ;;  %1275 = vmax.xlane.f32.xlu0 %v2834_v43 }
 0x279   : > { %1273 = vmax.xlane.f32.xlu1 %v2837_v46 }
 0x281   : > { %v1803_v22 = vpop.f32.mrf.mxu1 }
 0x282   : > { %v2888_v18 = vadd.f32 %v1803_v22, %v3244_v41 }
 0x283   : > { %v1284_v40 = vpop.xlane.xlu0 %1283  ;;  %v1230_v61 = vpop.f32.mrf.mxu1 }
 0x284   : > { %v1330_v31 = vsub.f32 %v2770_v10, %v1284_v40  ;;  %v2883_v13 = vadd.f32 %v3244_v41, %v1230_v61 }
 0x285   : > { %v1282_v21 = vpop.xlane.xlu1 %1281 }
 0x286   : > { %v1329_v25 = vsub.f32 %v2773_v6, %v1282_v21  ;;  %v1379_v8 = vmul.f32 1.442695, %v1330_v31 }
 0x287   : > { %v1250_v57 = vpop.xlane.xlu0 %1249 }
 0x288   : > { %v1313_v59 = vsub.f32 %v2777_v9, %v1250_v57  ;;  %v1347_v9 = vmul.f32 1.442695, %v1314_v3  ;;  %v1377_v60 = vmul.f32 1.442695, %v1329_v25 }
 0x289   : > { %v1286_v5 = vpop.xlane.xlu1 %1285 }
 0x28a   : > { %v1345_v19 = vmul.f32 1.442695, %v1313_v59  ;;  %v1331_v39 = vsub.f32 %v2781_v56, %v1286_v5 }
 0x28b   : > { %v1256_v54 = vpop.xlane.xlu0 %1255 }
 0x28c   : > { %1867 = vpow2.f32 %v1345_v19  ;;  %v1316_v10 = vsub.f32 %v2785_v49, %v1256_v54  ;;  %v1381_v47 = vmul.f32 1.442695, %v1331_v39 }
 0x28d   : > { %1869 = vpow2.f32 %v1347_v9 }
 0x28e   : > { %1871 = vpow2.f32 %v1377_v60  ;;  %v1351_v33 = vmul.f32 1.442695, %v1316_v10 }
 0x28f   : > { %v1288_v35 = vpop.xlane.xlu0 %1287  ;;  %1873 = vpow2.f32 %v1379_v8 }
 0x290   : > { %v1332_v63 = vsub.f32 %v2790_v51, %v1288_v35 }
 0x292   : > { %v1383_v42 = vmul.f32 1.442695, %v1332_v63 }
 0x293   : > { %v1782_v29 = vpop.f32.mrf.mxu0  ;;  %v1254_v36 = vpop.xlane.xlu0 %1253 }
 0x294   : > { %v2842_v28 = vadd.f32 %v1782_v29, %v3244_v41  ;;  %v1315_v6 = vsub.f32 %v2794_v45, %v1254_v36 }
 0x295   : > { %v1160_v26 = vpop.f32.mrf.mxu0  ;;  %v1258_v32 = vpop.xlane.xlu1 %1257 }
 0x296   : > { %v2845_v44 = vadd.f32 %v3244_v41, %v1160_v26  ;;  %1279 = vmax.xlane.f32.xlu0 %v2842_v28  ;;  %v1349_v45 = vmul.f32 1.442695, %v1315_v6  ;;  %v1317_v40 = vsub.f32 %v2797_v48, %v1258_v32 }
 0x297   : > { %v1806_v0 = vpop.f32.mrf.mxu1  ;;  %v1260_v49 = vpop.xlane.xlu0 %1259 }
 0x298   : > { %1277 = vmax.xlane.f32.xlu1 %v2845_v44  ;;  %1875 = vpow2.f32 %v1349_v45  ;;  %v2898_v57 = vadd.f32 %v1806_v0, %v3244_v41  ;;  %v1318_v51 = vsub.f32 %v2801_v27, %v1260_v49  ;;  %v1353_v50 = vmul.f32 1.442695, %v1317_v40 }
 0x299   : > { %v1240_v34 = vpop.f32.mrf.mxu1  ;;  %v1290_v2 = vpop.xlane.xlu1 %1289  ;;  %1877 = vpow2.f32 %v1351_v33 }
 0x29a   : > { %1291 = vmax.xlane.f32.xlu0 %v2849_v24  ;;  %v2894_v56 = vadd.f32 %v3244_v41, %v1240_v34  ;;  %1879 = vpow2.f32 %v1381_v47  ;;  %v1333_v15 = vsub.f32 %v2805_v14, %v1290_v2  ;;  %v2904_v48 = vpop.eup %1867  ;;  %v1355_v29 = vmul.f32 1.442695, %v1318_v51 }
 0x29b   : > { %1881 = vpow2.f32 %v1383_v42  ;;  %v2907_v12 = vpop.eup %1869  ;;  %v1264_v19 = vpop.xlane.xlu0 %1263 }
 0x29c   : > { %1293 = vmax.xlane.f32.xlu1 %v2853_v37  ;;  %1883 = vpow2.f32 %v1353_v50  ;;  %v1385_v30 = vmul.f32 1.442695, %v1333_v15  ;;  %v2911_v26 = vpop.eup %1871  ;;  %v1320_v8 = vsub.f32 %v2809_v58, %v1264_v19 }
 0x29d   : > { %v1262_v54 = vpop.xlane.xlu1 %1261  ;;  %1885 = vpow2.f32 %v1355_v29  ;;  %v2914_v14 = vpop.eup %1873 }
 0x29e   : > { %1295 = vmax.xlane.f32.xlu0 %v2858_v16  ;;  %v1319_v27 = vsub.f32 %v2813_v17, %v1262_v54  ;;  %1887 = vpow2.f32 %v1385_v30  ;;  %v1359_v49 = vmul.f32 1.442695, %v1320_v8 }
 0x2a0   : > { %1297 = vmax.xlane.f32.xlu1 %v2863_v53  ;;  %v1357_v55 = vmul.f32 1.442695, %v1319_v27 }
 0x2a2   : > { %1299 = vmax.xlane.f32.xlu0 %v2868_v20  ;;  %1889 = vpow2.f32 %v1357_v55 }
 0x2a4   : > { %1301 = vmax.xlane.f32.xlu1 %v2873_v38 }
 0x2a5   : > { %v2917_v21 = vpop.eup %1875 }
 0x2a6   : > { %1303 = vmax.xlane.f32.xlu0 %v2878_v52  ;;  %v2920_v35 = vpop.eup %1877 }
 0x2a7   : > { %v2923_v17 = vpop.eup %1879 }
 0x2a8   : > { %1305 = vmax.xlane.f32.xlu1 %v2883_v13  ;;  %v2926_v59 = vpop.eup %1881 }
 0x2a9   : > { %v2929_v7 = vpop.eup %1883 }
 0x2aa   : > { %1307 = vmax.xlane.f32.xlu0 %v2888_v18  ;;  %v2932_v3 = vpop.eup %1885 }
 0x2ab   : > { %v2935_v22 = vpop.eup %1887 }
 0x2ac   : > { %1309 = vmax.xlane.f32.xlu1 %v2894_v56 }
 0x2ae   : > { %1311 = vmax.xlane.f32.xlu0 %v2898_v57 }
 0x2af   : > { %v2938_v25 = vpop.eup %1889 }
 0x2b0   : > { %1409 = vadd.xlane.f32.xlu1 %v2904_v48 }
 0x2b2   : > { %1411 = vadd.xlane.f32.xlu0 %v2907_v12 }
 0x2b4   : > { %1441 = vadd.xlane.f32.xlu1 %v2911_v26 }
 0x2b5   : > { %v1268_v5 = vpop.xlane.xlu0 %1267 }
 0x2b6   : > { %1443 = vadd.xlane.f32.xlu0 %v2914_v14 }
 0x2b7   : > { %v1266_v36 = vpop.xlane.xlu1 %1265 }
 0x2b8   : > { %1413 = vadd.xlane.f32.xlu1 %v2917_v21  ;;  %v1321_v45 = vsub.f32 %v2821_v4, %v1266_v36 }
 0x2ba   : > { %1415 = vadd.xlane.f32.xlu0 %v2920_v35  ;;  %v1361_v42 = vmul.f32 1.442695, %v1321_v45 }
 0x2bc   : > { %1445 = vadd.xlane.f32.xlu1 %v2923_v17 }
 0x2be   : > { %1447 = vadd.xlane.f32.xlu0 %v2926_v59 }
 0x2c0   : > { %1417 = vadd.xlane.f32.xlu1 %v2929_v7 }
 0x2c2   : > { %1419 = vadd.xlane.f32.xlu0 %v2932_v3 }
 0x2c4   : > { %1449 = vadd.xlane.f32.xlu1 %v2935_v22 }
 0x2c8   : > { %1421 = vadd.xlane.f32.xlu1 %v2938_v25 }
 0x2db   : > { %v1272_v9 = vpop.xlane.xlu0 %1271 }
 0x2dc   : > { %v1324_v30 = vsub.f32 %v2826_v23, %v1272_v9 }
 0x2dd   : > { %v1270_v31 = vpop.xlane.xlu1 %1269 }
 0x300   : > { %v2941_v61 = vpop.xlane.xlu0 %1275 }
 0x302   : > { %v1274_v60 = vpop.xlane.xlu1 %1273 }
 0x31f   : > { %v2943_v6 = vpop.xlane.xlu0 %1279 }
 0x321   : > { %v2945_v32 = vpop.xlane.xlu1 %1277 }
 0x323   : > { %v1292_v0 = vpop.xlane.xlu0 %1291 }
 0x324   : > { %v1334_v10 = vsub.f32 %v2849_v24, %v1292_v0  ;;  %v1322_v24 = vsub.f32 %v2818_v11, %v1268_v5  ;;  %v1325_v11 = vsub.f32 %v2837_v46, %v1274_v60 }
 0x325   : > { %v1294_v39 = vpop.xlane.xlu1 %1293 }
 0x326   : > { %v1387_v34 = vmul.f32 1.442695, %v1334_v10  ;;  %v1335_v33 = vsub.f32 %v2853_v37, %v1294_v39  ;;  %v1323_v37 = vsub.f32 %v2829_v62, %v1270_v31  ;;  %v1363_v29 = vmul.f32 1.442695, %v1322_v24 }
 0x327   : > { %v1296_v63 = vpop.xlane.xlu0 %1295  ;;  %v1367_v62 = vmul.f32 1.442695, %v1324_v30 }
 0x328   : > { %1891 = vpow2.f32 %v1387_v34  ;;  %v1389_v2 = vmul.f32 1.442695, %v1335_v33  ;;  %v1336_v47 = vsub.f32 %v2858_v16, %v1296_v63  ;;  %v1365_v55 = vmul.f32 1.442695, %v1323_v37 }
 0x329   : > { %v1298_v40 = vpop.xlane.xlu1 %1297 }
 0x32a   : > { %1893 = vpow2.f32 %v1389_v2  ;;  %v1337_v51 = vsub.f32 %v2863_v53, %v1298_v40  ;;  %v1391_v50 = vmul.f32 1.442695, %v1336_v47 }
 0x32b   : > { %v1300_v58 = vpop.xlane.xlu0 %1299  ;;  %1895 = vpow2.f32 %v1359_v49 }
 0x32c   : > { %1897 = vpow2.f32 %v1361_v42  ;;  %v1393_v15 = vmul.f32 1.442695, %v1337_v51  ;;  %v1338_v16 = vsub.f32 %v2868_v20, %v1300_v58 }
 0x32d   : > { %v1302_v4 = vpop.xlane.xlu1 %1301  ;;  %1899 = vpow2.f32 %v1391_v50 }
 0x32e   : > { %1901 = vpow2.f32 %v1393_v15  ;;  %v1339_v53 = vsub.f32 %v2873_v38, %v1302_v4  ;;  %v1395_v5 = vmul.f32 1.442695, %v1338_v16  ;;  %v1369_v38 = vmul.f32 1.442695, %v1325_v11 }
 0x32f   : > { %v1304_v54 = vpop.xlane.xlu0 %1303  ;;  %1903 = vpow2.f32 %v1363_v29 }
 0x330   : > { %1905 = vpow2.f32 %v1365_v55  ;;  %v1397_v0 = vmul.f32 1.442695, %v1339_v53  ;;  %v1340_v23 = vsub.f32 %v2878_v52, %v1304_v54  ;;  %v1326_v52 = vsub.f32 %v2834_v43, %v2941_v61 }
 0x331   : > { %v1306_v27 = vpop.xlane.xlu1 %1305  ;;  %1907 = vpow2.f32 %v1395_v5 }
 0x332   : > { %1909 = vpow2.f32 %v1367_v62  ;;  %v1341_v60 = vsub.f32 %v2883_v13, %v1306_v27  ;;  %v1399_v39 = vmul.f32 1.442695, %v1340_v23  ;;  %v1327_v13 = vsub.f32 %v2845_v44, %v2945_v32 }
 0x333   : > { %v1308_v19 = vpop.xlane.xlu0 %1307  ;;  %1911 = vpow2.f32 %v1397_v0  ;;  %v1371_v43 = vmul.f32 1.442695, %v1326_v52 }
 0x334   : > { %v1401_v33 = vmul.f32 1.442695, %v1341_v60  ;;  %v1342_v61 = vsub.f32 %v2888_v18, %v1308_v19  ;;  %v1373_v40 = vmul.f32 1.442695, %v1327_v13  ;;  %v1328_v18 = vsub.f32 %v2842_v28, %v2943_v6 }
 0x335   : > { %v2959_v36 = vpop.eup %1891  ;;  %v1310_v31 = vpop.xlane.xlu1 %1309 }
 0x336   : > { %1451 = vadd.xlane.f32.xlu0 %v2959_v36  ;;  %v1343_v44 = vsub.f32 %v2894_v56, %v1310_v31  ;;  %v1403_v51 = vmul.f32 1.442695, %v1342_v61  ;;  %v1375_v6 = vmul.f32 1.442695, %v1328_v18 }
 0x337   : > { %v2962_v20 = vpop.eup %1893  ;;  %v2965_v9 = vpop.xlane.xlu0 %1311 }
 0x338   : > { %1453 = vadd.xlane.f32.xlu1 %v2962_v20  ;;  %v2968_v46 = vpop.eup %1895  ;;  %v1405_v56 = vmul.f32 1.442695, %v1343_v44  ;;  %v1344_v54 = vsub.f32 %v2898_v57, %v2965_v9 }
 0x339   : > { %v1410_v8 = vpop.xlane.xlu1 %1409  ;;  %v2972_v10 = vpop.eup %1897 }
 0x33a   : > { %1423 = vadd.xlane.f32.xlu0 %v2968_v46  ;;  %1913 = vrcp.f32 %v1410_v8  ;;  %v2977_v34 = vpop.eup %1899  ;;  %v1407_v5 = vmul.f32 1.442695, %v1344_v54 }
 0x33b   : > { %v1412_v45 = vpop.xlane.xlu0 %1411  ;;  %1915 = vpow2.f32 %v1369_v38  ;;  %v2982_v49 = vpop.eup %1901 }
 0x33c   : > { %1425 = vadd.xlane.f32.xlu1 %v2972_v10  ;;  %1917 = vrcp.f32 %v1412_v45  ;;  %v2986_v47 = vpop.eup %1903 }
 0x33d   : > { %v1442_v63 = vpop.xlane.xlu1 %1441  ;;  %v2990_v42 = vpop.eup %1905 }
 0x33e   : > { %1919 = vrcp.f32 %v1442_v63  ;;  %1455 = vadd.xlane.f32.xlu0 %v2977_v34  ;;  %v2998_v24 = vpop.eup %1907 }
 0x33f   : > { %1921 = vpow2.f32 %v1399_v39  ;;  %v1444_v2 = vpop.xlane.xlu0 %1443  ;;  %v3002_v4 = vpop.eup %1909 }
 0x340   : > { %1923 = vrcp.f32 %v1444_v2  ;;  %1457 = vadd.xlane.f32.xlu1 %v2982_v49  ;;  %v3006_v28 = vpop.eup %1911 }
 0x341   : > { %1925 = vpow2.f32 %v1401_v33  ;;  %v1414_v32 = vpop.xlane.xlu1 %1413 }
 0x342   : > { %1927 = vrcp.f32 %v1414_v32  ;;  %1427 = vadd.xlane.f32.xlu0 %v2986_v47 }
 0x343   : > { %1929 = vpow2.f32 %v1371_v43  ;;  %v2994_v58 = vpop.xlane.xlu0 %1415 }
 0x344   : > { %1931 = vrcp.f32 %v2994_v58  ;;  %1429 = vadd.xlane.f32.xlu1 %v2990_v42 }
 0x345   : > { %1933 = vpow2.f32 %v1373_v40  ;;  %v3000_v50 = vpop.xlane.xlu1 %1445 }
 0x346   : > { %1935 = vrcp.f32 %v3000_v50  ;;  %1459 = vadd.xlane.f32.xlu0 %v2998_v24 }
 0x347   : > { %1937 = vpow2.f32 %v1403_v51  ;;  %v3008_v37 = vpop.xlane.xlu0 %1447  ;;  %v1914_v15 = vpop.eup %1913 }
 0x348   : > { %1939 = vrcp.f32 %v3008_v37  ;;  %1461 = vadd.xlane.f32.xlu1 %v3006_v28  ;;  %v3014_v29 = vpop.eup %1915  ;;  %v1505_v16 = vmul.f32 %v1914_v15, %v1410_v8 }
 0x349   : > { %1941 = vpow2.f32 %v1405_v56  ;;  %v3016_v30 = vpop.xlane.xlu1 %1417  ;;  %v1918_v27 = vpop.eup %1917 }
 0x34a   : > { %1943 = vrcp.f32 %v3016_v30  ;;  %1431 = vadd.xlane.f32.xlu0 %v3002_v4  ;;  %v1537_v53 = vsub.f32 2.0, %v1505_v16  ;;  %v1506_v57 = vmul.f32 %v1918_v27, %v1412_v45 }
 0x34b   : > { %v1920_v55 = vpop.eup %1919  ;;  %1945 = vpow2.f32 %v1375_v6  ;;  %v3020_v19 = vpop.xlane.xlu0 %1419 }
 0x34c   : > { %v3022_v11 = vpop.eup %1921  ;;  %v1521_v62 = vmul.f32 %v1920_v55, %v1442_v63  ;;  %1947 = vrcp.f32 %v3020_v19  ;;  %1433 = vadd.xlane.f32.xlu1 %v3014_v29  ;;  %v1569_v0 = vmul.f32 %v1914_v15, %v1537_v53  ;;  %v1538_v23 = vsub.f32 2.0, %v1506_v57 }
 0x34d   : > { %v1924_v31 = vpop.eup %1923  ;;  %v3026_v9 = vpop.xlane.xlu1 %1449 }
 0x34e   : > { %v3028_v38 = vpop.eup %1925  ;;  %v1553_v60 = vsub.f32 2.0, %v1521_v62  ;;  %v1522_v8 = vmul.f32 %v1924_v31, %v1444_v2  ;;  %1949 = vrcp.f32 %v3026_v9  ;;  %1463 = vadd.xlane.f32.xlu0 %v3022_v11  ;;  %v1601_v39 = vmul.f32 %v2904_v48, %v1569_v0 }
 0x34f   : > { %v1928_v52 = vpop.eup %1927  ;;  %v1570_v45 = vmul.f32 %v1918_v27, %v1538_v23  ;;  %1951 = vpow2.f32 %v1407_v5 }
 0x350   : > { %v3040_v13 = vpop.eup %1929  ;;  %v1585_v33 = vmul.f32 %v1920_v55, %v1553_v60  ;;  %v1554_v63 = vsub.f32 2.0, %v1522_v8  ;;  %v1507_v43 = vmul.f32 %v1928_v52, %v1414_v32  ;;  %1465 = vadd.xlane.f32.xlu1 %v3028_v38  ;;  %1635 = vst.msk [vmem:[%s3035_s10] sm:$0xff] %vm1634_vm1, %v1601_v39 }
 0x351   : > { %v1932_v61 = vpop.eup %1931  ;;  %v1602_v2 = vmul.f32 %v2907_v12, %v1570_v45  ;;  %v1422_v40 = vpop.xlane.xlu1 %1421 }
 0x352   : > { %v3046_v44 = vpop.eup %1933  ;;  %v1617_v48 = vmul.f32 %v2911_v26, %v1585_v33  ;;  %v1586_v18 = vmul.f32 %v1924_v31, %v1554_v63  ;;  %v1539_v51 = vsub.f32 2.0, %v1507_v43  ;;  %v1508_v56 = vmul.f32 %v1932_v61, %v2994_v58  ;;  %1435 = vadd.xlane.f32.xlu0 %v3040_v13 }
 0x353   : > { %v1936_v32 = vpop.eup %1935  ;;  %1636 = vst.msk [vmem:[%s3035_s10 + $0x8] sm:$0xff] %vm1634_vm1, %v1602_v2  ;;  %1953 = vrcp.f32 %v1422_v40 }
 0x354   : > { %v3053_v6 = vpop.eup %1937  ;;  %1651 = vst.msk [vmem:[%s3035_s10 + $0x80] sm:$0xff] %vm1634_vm1, %v1617_v48  ;;  %v1618_v12 = vmul.f32 %v2914_v14, %v1586_v18  ;;  %v1571_v15 = vmul.f32 %v1928_v52, %v1539_v51  ;;  %v1540_v26 = vsub.f32 2.0, %v1508_v56  ;;  %v1523_v54 = vmul.f32 %v1936_v32, %v3000_v50  ;;  %1437 = vadd.xlane.f32.xlu1 %v3046_v44 }
 0x355   : > { %v1940_v58 = vpop.eup %1939 }
 0x356   : > { %v3060_v16 = vpop.eup %1941  ;;  %1652 = vst.msk [vmem:[%s3035_s10 + $0x88] sm:$0xff] %vm1634_vm1, %v1618_v12  ;;  %v1603_v27 = vmul.f32 %v2917_v21, %v1571_v15  ;;  %v1572_v55 = vmul.f32 %v1932_v61, %v1540_v26  ;;  %v1555_v53 = vsub.f32 2.0, %v1523_v54  ;;  %v1524_v57 = vmul.f32 %v1940_v58, %v3008_v37  ;;  %1467 = vadd.xlane.f32.xlu0 %v3053_v6 }
 0x357   : > { %v1944_v14 = vpop.eup %1943 }
 0x358   : > { %v3067_v5 = vpop.eup %1945  ;;  %1637 = vst.msk [vmem:[%s3035_s10 + $0x10] sm:$0xff] %vm1634_vm1, %v1603_v27  ;;  %v1604_v50 = vmul.f32 %v2920_v35, %v1572_v55  ;;  %v1587_v62 = vmul.f32 %v1936_v32, %v1555_v53  ;;  %v1556_v31 = vsub.f32 2.0, %v1524_v57  ;;  %v1509_v0 = vmul.f32 %v1944_v14, %v3016_v30  ;;  %1469 = vadd.xlane.f32.xlu1 %v3060_v16 }
 0x359   : > { %v1948_v21 = vpop.eup %1947 }
 0x35a   : > { %1638 = vst.msk [vmem:[%s3035_s10 + $0x18] sm:$0xff] %vm1634_vm1, %v1604_v50  ;;  %v1619_v37 = vmul.f32 %v2923_v17, %v1587_v62  ;;  %v1588_v23 = vmul.f32 %v1940_v58, %v1556_v31  ;;  %v1541_v60 = vsub.f32 2.0, %v1509_v0  ;;  %v1510_v8 = vmul.f32 %v1948_v21, %v3020_v19  ;;  %1439 = vadd.xlane.f32.xlu0 %v3067_v5 }
 0x35b   : > { %v1950_v35 = vpop.eup %1949 }
 0x35c   : > { %1653 = vst.msk [vmem:[%s3035_s10 + $0x90] sm:$0xff] %vm1634_vm1, %v1619_v37  ;;  %v1620_v30 = vmul.f32 %v2926_v59, %v1588_v23  ;;  %v1573_v52 = vmul.f32 %v1944_v14, %v1541_v60  ;;  %v1542_v39 = vsub.f32 2.0, %v1510_v8  ;;  %v1525_v45 = vmul.f32 %v1950_v35, %v3026_v9  ;;  %v3083_v33 = vpop.eup %1951 }
 0x35e   : > { %1654 = vst.msk [vmem:[%s3035_s10 + $0x98] sm:$0xff] %vm1634_vm1, %v1620_v30  ;;  %v1605_v17 = vmul.f32 %v2929_v7, %v1573_v52  ;;  %v1574_v19 = vmul.f32 %v1948_v21, %v1542_v39  ;;  %v1557_v63 = vsub.f32 2.0, %v1525_v45  ;;  %1471 = vadd.xlane.f32.xlu0 %v3083_v33 }
 0x360   : > { %v1954_v43 = vpop.eup %1953  ;;  %1639 = vst.msk [vmem:[%s3035_s10 + $0x20] sm:$0xff] %vm1634_vm1, %v1605_v17  ;;  %v1606_v59 = vmul.f32 %v2932_v3, %v1574_v19  ;;  %v1589_v61 = vmul.f32 %v1950_v35, %v1557_v63 }
 0x361   : > { %v1511_v2 = vmul.f32 %v1954_v43, %v1422_v40 }
 0x362   : > { %1640 = vst.msk [vmem:[%s3035_s10 + $0x28] sm:$0xff] %vm1634_vm1, %v1606_v59  ;;  %v1621_v9 = vmul.f32 %v2935_v22, %v1589_v61 }
 0x363   : > { %v1543_v48 = vsub.f32 2.0, %v1511_v2 }
 0x364   : > { %1655 = vst.msk [vmem:[%s3035_s10 + $0xa0] sm:$0xff] %vm1634_vm1, %v1621_v9 }
 0x365   : > { %v1575_v18 = vmul.f32 %v1954_v43, %v1543_v48 }
 0x367   : > { %v1607_v7 = vmul.f32 %v2938_v25, %v1575_v18 }
 0x369   : > { %1641 = vst.msk [vmem:[%s3035_s10 + $0x30] sm:$0xff] %vm1634_vm1, %v1607_v7 }
 0x3bf   : > { %v1452_v51 = vpop.xlane.xlu0 %1451 }
 0x3c0   : > { %1955 = vrcp.f32 %v1452_v51 }
 0x3c1   : > { %v1454_v56 = vpop.xlane.xlu1 %1453 }
 0x3c2   : > { %1957 = vrcp.f32 %v1454_v56 }
 0x3c3   : > { %v1424_v32 = vpop.xlane.xlu0 %1423 }
 0x3c4   : > { %1959 = vrcp.f32 %v1424_v32 }
 0x3c5   : > { %v1426_v3 = vpop.xlane.xlu1 %1425 }
 0x3c6   : > { %1961 = vrcp.f32 %v1426_v3 }
 0x3c7   : > { %v1456_v40 = vpop.xlane.xlu0 %1455 }
 0x3c8   : > { %1963 = vrcp.f32 %v1456_v40 }
 0x3c9   : > { %v1458_v12 = vpop.xlane.xlu1 %1457 }
 0x3ca   : > { %1965 = vrcp.f32 %v1458_v12 }
 0x3cb   : > { %v1428_v22 = vpop.xlane.xlu0 %1427 }
 0x3cc   : > { %1967 = vrcp.f32 %v1428_v22 }
 0x3cd   : > { %v1956_v15 = vpop.eup %1955  ;;  %v1430_v26 = vpop.xlane.xlu1 %1429 }
 0x3ce   : > { %v1526_v54 = vmul.f32 %v1956_v15, %v1452_v51  ;;  %1969 = vrcp.f32 %v1430_v26 }
 0x3cf   : > { %v1958_v25 = vpop.eup %1957  ;;  %v1460_v58 = vpop.xlane.xlu0 %1459 }
 0x3d0   : > { %v1558_v27 = vsub.f32 2.0, %v1526_v54  ;;  %v1527_v55 = vmul.f32 %v1958_v25, %v1454_v56  ;;  %1971 = vrcp.f32 %v1460_v58 }
 0x3d1   : > { %v1960_v53 = vpop.eup %1959  ;;  %v1462_v57 = vpop.xlane.xlu1 %1461 }
 0x3d2   : > { %v1590_v14 = vmul.f32 %v1956_v15, %v1558_v27  ;;  %v1559_v50 = vsub.f32 2.0, %v1527_v55  ;;  %v1512_v62 = vmul.f32 %v1960_v53, %v1424_v32  ;;  %1973 = vrcp.f32 %v1462_v57 }
 0x3d3   : > { %v1962_v31 = vpop.eup %1961  ;;  %v1432_v0 = vpop.xlane.xlu0 %1431 }
 0x3d4   : > { %v1622_v21 = vmul.f32 %v2959_v36, %v1590_v14  ;;  %v1591_v37 = vmul.f32 %v1958_v25, %v1559_v50  ;;  %v1544_v23 = vsub.f32 2.0, %v1512_v62  ;;  %v1513_v60 = vmul.f32 %v1962_v31, %v1426_v3 }
 0x3d5   : > { %v1964_v8 = vpop.eup %1963  ;;  %1975 = vrcp.f32 %v1432_v0  ;;  %v1434_v35 = vpop.xlane.xlu1 %1433 }
 0x3d6   : > { %1656 = vst.msk [vmem:[%s3035_s10 + $0xa8] sm:$0xff] %vm1634_vm1, %v1622_v21  ;;  %v1623_v30 = vmul.f32 %v2962_v20, %v1591_v37  ;;  %v1576_v52 = vmul.f32 %v1960_v53, %v1544_v23  ;;  %v1545_v39 = vsub.f32 2.0, %v1513_v60  ;;  %v1528_v45 = vmul.f32 %v1964_v8, %v1456_v40 }
 0x3d7   : > { %v1966_v17 = vpop.eup %1965  ;;  %1977 = vrcp.f32 %v1434_v35  ;;  %v1464_v19 = vpop.xlane.xlu0 %1463 }
 0x3d8   : > { %1657 = vst.msk [vmem:[%s3035_s10 + $0xb0] sm:$0xff] %vm1634_vm1, %v1623_v30  ;;  %v1608_v36 = vmul.f32 %v2968_v46, %v1576_v52  ;;  %v1577_v63 = vmul.f32 %v1962_v31, %v1545_v39  ;;  %v1560_v43 = vsub.f32 2.0, %v1528_v45  ;;  %v1529_v59 = vmul.f32 %v1966_v17, %v1458_v12 }
 0x3d9   : > { %v1968_v61 = vpop.eup %1967  ;;  %1979 = vrcp.f32 %v1464_v19  ;;  %v1466_v2 = vpop.xlane.xlu1 %1465 }
 0x3da   : > { %1642 = vst.msk [vmem:[%s3035_s10 + $0x38] sm:$0xff] %vm1634_vm1, %v1608_v36  ;;  %v1609_v20 = vmul.f32 %v2972_v10, %v1577_v63  ;;  %v1592_v9 = vmul.f32 %v1964_v8, %v1560_v43  ;;  %v1561_v48 = vsub.f32 2.0, %v1529_v59  ;;  %v1514_v18 = vmul.f32 %v1968_v61, %v1428_v22 }
 0x3db   : > { %v1970_v7 = vpop.eup %1969  ;;  %1981 = vrcp.f32 %v1466_v2  ;;  %v1436_v51 = vpop.xlane.xlu0 %1435 }
 0x3dc   : > { %1643 = vst.msk [vmem:[%s3035_s10 + $0x40] sm:$0xff] %vm1634_vm1, %v1609_v20  ;;  %v1624_v46 = vmul.f32 %v2977_v34, %v1592_v9  ;;  %v1593_v56 = vmul.f32 %v1966_v17, %v1561_v48  ;;  %v1546_v32 = vsub.f32 2.0, %v1514_v18  ;;  %v1515_v3 = vmul.f32 %v1970_v7, %v1430_v26 }
 0x3dd   : > { %v1972_v40 = vpop.eup %1971  ;;  %1983 = vrcp.f32 %v1436_v51  ;;  %v1438_v12 = vpop.xlane.xlu1 %1437 }
 0x3de   : > { %1658 = vst.msk [vmem:[%s3035_s10 + $0xb8] sm:$0xff] %vm1634_vm1, %v1624_v46  ;;  %v1625_v10 = vmul.f32 %v2982_v49, %v1593_v56  ;;  %v1578_v22 = vmul.f32 %v1968_v61, %v1546_v32  ;;  %v1547_v15 = vsub.f32 2.0, %v1515_v3  ;;  %v1530_v54 = vmul.f32 %v1972_v40, %v1460_v58 }
 0x3df   : > { %v1974_v25 = vpop.eup %1973  ;;  %1985 = vrcp.f32 %v1438_v12  ;;  %v1468_v27 = vpop.xlane.xlu0 %1467 }
 0x3e0   : > { %1659 = vst.msk [vmem:[%s3035_s10 + $0xc0] sm:$0xff] %vm1634_vm1, %v1625_v10  ;;  %v1610_v34 = vmul.f32 %v2986_v47, %v1578_v22  ;;  %v1579_v26 = vmul.f32 %v1970_v7, %v1547_v15  ;;  %v1562_v55 = vsub.f32 2.0, %v1530_v54  ;;  %v1531_v53 = vmul.f32 %v1974_v25, %v1462_v57 }
 0x3e1   : > { %1987 = vrcp.f32 %v1468_v27  ;;  %v1470_v14 = vpop.xlane.xlu1 %1469 }
 0x3e2   : > { %v1976_v50 = vpop.eup %1975  ;;  %1644 = vst.msk [vmem:[%s3035_s10 + $0x48] sm:$0xff] %vm1634_vm1, %v1610_v34  ;;  %v1611_v49 = vmul.f32 %v2990_v42, %v1579_v26  ;;  %v1594_v58 = vmul.f32 %v1972_v40, %v1562_v55  ;;  %v1563_v62 = vsub.f32 2.0, %v1531_v53  ;;  %1989 = vrcp.f32 %v1470_v14 }
 0x3e3   : > { %v1516_v31 = vmul.f32 %v1976_v50, %v1432_v0  ;;  %v1440_v21 = vpop.xlane.xlu0 %1439 }
 0x3e4   : > { %v1978_v37 = vpop.eup %1977  ;;  %1645 = vst.msk [vmem:[%s3035_s10 + $0x50] sm:$0xff] %vm1634_vm1, %v1611_v49  ;;  %v1626_v47 = vmul.f32 %v2998_v24, %v1594_v58  ;;  %v1595_v57 = vmul.f32 %v1974_v25, %v1563_v62  ;;  %1991 = vrcp.f32 %v1440_v21 }
 0x3e5   : > { %v1548_v23 = vsub.f32 2.0, %v1516_v31  ;;  %v1517_v60 = vmul.f32 %v1978_v37, %v1434_v35 }
 0x3e6   : > { %v1980_v8 = vpop.eup %1979  ;;  %1660 = vst.msk [vmem:[%s3035_s10 + $0xc8] sm:$0xff] %vm1634_vm1, %v1626_v47  ;;  %v1627_v42 = vmul.f32 %v3006_v28, %v1595_v57 }
 0x3e7   : > { %v1580_v30 = vmul.f32 %v1976_v50, %v1548_v23  ;;  %v1549_v52 = vsub.f32 2.0, %v1517_v60  ;;  %v1532_v0 = vmul.f32 %v1980_v8, %v1464_v19  ;;  %v1472_v39 = vpop.xlane.xlu0 %1471 }
 0x3e8   : > { %v1982_v45 = vpop.eup %1981  ;;  %1661 = vst.msk [vmem:[%s3035_s10 + $0xd0] sm:$0xff] %vm1634_vm1, %v1627_v42  ;;  %1993 = vrcp.f32 %v1472_v39 }
 0x3e9   : > { %v1612_v24 = vmul.f32 %v3002_v4, %v1580_v30  ;;  %v1581_v17 = vmul.f32 %v1978_v37, %v1549_v52  ;;  %v1564_v36 = vsub.f32 2.0, %v1532_v0  ;;  %v1533_v35 = vmul.f32 %v1982_v45, %v1466_v2 }
 0x3ea   : > { %v1984_v63 = vpop.eup %1983 }
 0x3eb   : > { %1646 = vst.msk [vmem:[%s3035_s10 + $0x58] sm:$0xff] %vm1634_vm1, %v1612_v24  ;;  %v1613_v28 = vmul.f32 %v3014_v29, %v1581_v17  ;;  %v1596_v43 = vmul.f32 %v1980_v8, %v1564_v36  ;;  %v1565_v59 = vsub.f32 2.0, %v1533_v35  ;;  %v1518_v19 = vmul.f32 %v1984_v63, %v1436_v51 }
 0x3ec   : > { %v1986_v61 = vpop.eup %1985 }
 0x3ed   : > { %1647 = vst.msk [vmem:[%s3035_s10 + $0x60] sm:$0xff] %vm1634_vm1, %v1613_v28  ;;  %v1628_v20 = vmul.f32 %v3022_v11, %v1596_v43  ;;  %v1597_v9 = vmul.f32 %v1982_v45, %v1565_v59  ;;  %v1550_v4 = vsub.f32 2.0, %v1518_v19  ;;  %v1519_v48 = vmul.f32 %v1986_v61, %v1438_v12 }
 0x3ee   : > { %v1988_v18 = vpop.eup %1987 }
 0x3ef   : > { %v1990_v2 = vpop.eup %1989  ;;  %1662 = vst.msk [vmem:[%s3035_s10 + $0xd8] sm:$0xff] %vm1634_vm1, %v1628_v20  ;;  %v1629_v7 = vmul.f32 %v3028_v38, %v1597_v9  ;;  %v1582_v29 = vmul.f32 %v1984_v63, %v1550_v4  ;;  %v1551_v46 = vsub.f32 2.0, %v1519_v48  ;;  %v1534_v51 = vmul.f32 %v1988_v18, %v1468_v27 }
 0x3f0   : > { %v1535_v56 = vmul.f32 %v1990_v2, %v1470_v14 }
 0x3f1   : > { %v1992_v32 = vpop.eup %1991  ;;  %1663 = vst.msk [vmem:[%s3035_s10 + $0xe0] sm:$0xff] %vm1634_vm1, %v1629_v7  ;;  %v1614_v11 = vmul.f32 %v3040_v13, %v1582_v29  ;;  %v1583_v3 = vmul.f32 %v1986_v61, %v1551_v46  ;;  %v1566_v40 = vsub.f32 2.0, %v1534_v51 }
 0x3f2   : > { %v1567_v12 = vsub.f32 2.0, %v1535_v56  ;;  %v1520_v10 = vmul.f32 %v1992_v32, %v1440_v21 }
 0x3f3   : > { %1648 = vst.msk [vmem:[%s3035_s10 + $0x68] sm:$0xff] %vm1634_vm1, %v1614_v11  ;;  %v1615_v38 = vmul.f32 %v3046_v44, %v1583_v3  ;;  %v1598_v22 = vmul.f32 %v1988_v18, %v1566_v40 }
 0x3f4   : > { %v1599_v15 = vmul.f32 %v1990_v2, %v1567_v12  ;;  %v1552_v54 = vsub.f32 2.0, %v1520_v10 }
 0x3f5   : > { %v1994_v25 = vpop.eup %1993  ;;  %1649 = vst.msk [vmem:[%s3035_s10 + $0x70] sm:$0xff] %vm1634_vm1, %v1615_v38  ;;  %v1630_v13 = vmul.f32 %v3053_v6, %v1598_v22 }
 0x3f6   : > { %v1631_v27 = vmul.f32 %v3060_v16, %v1599_v15  ;;  %v1584_v34 = vmul.f32 %v1992_v32, %v1552_v54  ;;  %v1536_v26 = vmul.f32 %v1994_v25, %v1472_v39 }
 0x3f7   : > { %1664 = vst.msk [vmem:[%s3035_s10 + $0xe8] sm:$0xff] %vm1634_vm1, %v1630_v13 }
 0x3f8   : > { %1665 = vst.msk [vmem:[%s3035_s10 + $0xf0] sm:$0xff] %vm1634_vm1, %v1631_v27  ;;  %v1616_v55 = vmul.f32 %v3067_v5, %v1584_v34  ;;  %v1568_v44 = vsub.f32 2.0, %v1536_v26 }
 0x3fa   : > { %1650 = vst.msk [vmem:[%s3035_s10 + $0x78] sm:$0xff] %vm1634_vm1, %v1616_v55  ;;  %v1600_v53 = vmul.f32 %v1994_v25, %v1568_v44  ;;  %37 = sbr.rel (!%p35_p0) target bundleno = 6 (0x6), region = 49 }
 0x3fc   : > { %v1632_v14 = vmul.f32 %v3083_v33, %v1600_v53 }
 0x3fe   : > { %1666 = vst.msk [vmem:[%s3035_s10 + $0xf8] sm:$0xff] %vm1634_vm1, %v1632_v14 }

</bundles_post_ra>
